<compile_context>
chip_gen: v5e
topology: v5e:2x2
jax: 0.10.0
libtpu: 0.0.40
codegen_flags: <defaults>
</compile_context>

<pallas_src>
import jax
import jax.numpy as jnp
import numpy as np
from jax.experimental import pallas as pl
from jax.experimental.pallas import tpu as pltpu


def lstm_kernel(x_ref, h0_ref, c0_ref, wih_ref, whh_ref, b_ref,
                wdec_ref, bdec_ref, out_ref):
    Bp, H = h0_ref.shape
    T = x_ref.shape[0] // Bp
    H3 = 3 * H

    whh = whh_ref[...]            # bf16 (H, 4H), loaded once outside the loop

    # Prologue: hoisted input projection + fused bias for all T steps in one
    # M = T*Bp MXU matmul.  Kept as an SSA value (no explicit VMEM scratch);
    # columns are pre-ordered (i, f, o, g) with the (i, f, o) columns
    # pre-scaled by 0.5 in the wrapper (tanh-based sigmoid).
    xproj = (jnp.dot(x_ref[...], wih_ref[...],
                     preferred_element_type=jnp.float32)
             + b_ref[...])        # (T*Bp, 4H) f32

    h = h0_ref[...]               # f32 (Bp, H) carried state
    c = c0_ref[...]               # f32 (Bp, H)

    # T is small and static: a fully-unrolled Python loop keeps every slice
    # static and gives the LLO scheduler full visibility of the chain.
    for t in range(T):
        gates = (xproj[t * Bp:(t + 1) * Bp, :]
                 + jnp.dot(h.astype(whh.dtype), whh,
                           preferred_element_type=jnp.float32))   # (Bp, 4H) f32
        tg = jnp.tanh(gates)                 # single EUP op covers all 4 gates
        ifo = 0.5 * tg[:, :H3] + 0.5         # sigmoid(x) = 0.5*tanh(0.5x) + 0.5
        i_g = ifo[:, 0:H]
        f_g = ifo[:, H:2 * H]
        o_g = ifo[:, 2 * H:H3]
        g_g = tg[:, H3:]                     # tanh gate (already tanh'ed)
        c = f_g * c + i_g * g_g
        h = jnp.tanh(o_g * jnp.tanh(c))      # module's extra tanh on hx

    # Decoder (runs once): lane-dense (Bp, 128) store; real output is column 0.
    out_ref[...] = (jnp.dot(h.astype(wdec_ref.dtype), wdec_ref[...],
                            preferred_element_type=jnp.float32)
                    + bdec_ref[...])


def simple_lstm_forward(x_flat, h0, c0, wih_t, whh_t, bias, wdec_t, bdec):
    """x_flat: (T*Bp, Dp) bf16, row t*Bp+b = embedded token of step t, batch b.
    Returns padded (Bp, 128) f32; real result is [:B, :1]."""
    Bp, _ = h0.shape
    out_pad = pl.pallas_call(
        lstm_kernel,
        out_shape=jax.ShapeDtypeStruct((Bp, wdec_t.shape[1]), jnp.float32),
        in_specs=[pl.BlockSpec(memory_space=pltpu.MemorySpace.VMEM)] * 8,
        out_specs=pl.BlockSpec(memory_space=pltpu.MemorySpace.VMEM),
    )(x_flat, h0, c0, wih_t, whh_t, bias, wdec_t, bdec)
    return out_pad


def reference_forward(x_emb, h0, c0, wih_t, whh_t, bias, wdec_t, bdec):
    """Pure-JAX f32 reference mirroring the PyTorch forward (torch gate order
    (i, f, g, o), unpadded / unpermuted weights)."""
    H = h0.shape[1]
    hx, cx = h0, c0
    for t in range(x_emb.shape[0]):
        gates = x_emb[t] @ wih_t + hx @ whh_t + bias
        i_g = jax.nn.sigmoid(gates[:, 0:H])
        f_g = jax.nn.sigmoid(gates[:, H:2 * H])
        g_g = jnp.tanh(gates[:, 2 * H:3 * H])
        o_g = jax.nn.sigmoid(gates[:, 3 * H:4 * H])
        cx = f_g * cx + i_g * g_g
        hx = jnp.tanh(o_g * jnp.tanh(cx))
    return hx @ wdec_t + bdec


if __name__ == "__main__":
    key = jax.random.PRNGKey(0)

    # Shapes consistent with the module: vocab=10002, input_dim=100 (fixed),
    # hidden_dim=128 (constructor arg; lane-aligned), seq=6, batch=8.
    vocab, input_dim, hidden_dim = 10002, 100, 128
    batch, seq_len = 8, 6
    b_pad = 16    # batch padded so bf16 LHS is a full (16,128) sublane tile
    d_pad = 128   # input_dim padded to lane width
    n_pad = 128   # decoder output padded to lane width
    H = hidden_dim

    keys = jax.random.split(key, 10)
    embedding = jax.random.normal(keys[0], (vocab, input_dim), jnp.float32)
    scale = 1.0 / np.sqrt(hidden_dim)
    w_ih = jax.random.uniform(keys[1], (4 * H, input_dim), jnp.float32, -scale, scale)
    w_hh = jax.random.uniform(keys[2], (4 * H, H), jnp.float32, -scale, scale)
    b_ih = jax.random.uniform(keys[3], (4 * H,), jnp.float32, -scale, scale)
    b_hh = jax.random.uniform(keys[4], (4 * H,), jnp.float32, -scale, scale)
    w_dec = jax.random.uniform(keys[5], (1, H), jnp.float32, -scale, scale)
    b_dec = jax.random.uniform(keys[6], (1,), jnp.float32, -scale, scale)

    # Inputs: token ids (B, T); initial hx/cx (torch.randn in the module) drawn
    # deterministically here.
    x_in = jax.random.randint(keys[7], (batch, seq_len), 0, vocab, jnp.int32)
    h0 = jax.random.normal(keys[8], (batch, H), jnp.float32)
    c0 = jax.random.normal(keys[9], (batch, H), jnp.float32)

    # ---- Reference-side prep (f32, torch gate order (i, f, g, o)) ----------
    x_emb = jnp.take(embedding, x_in.T, axis=0)              # (T, B, D) f32
    wih_t_ref = w_ih.T                                       # (D, 4H)
    whh_t_ref = w_hh.T                                       # (H, 4H)
    bias_ref = (b_ih + b_hh).reshape(1, 4 * H)               # (1, 4H)
    wdec_t = w_dec.T                                         # (H, 1)
    bdec = b_dec.reshape(1, 1)                               # (1, 1)

    # ---- Kernel-side prep (one-time) ---------------------------------------
    # Gate permutation torch (i, f, g, o) -> kernel (i, f, o, g): the three
    # sigmoid gates become contiguous [0:3H], tanh gate is [3H:4H].
    perm = np.concatenate([np.arange(0, H), np.arange(H, 2 * H),
                           np.arange(3 * H, 4 * H), np.arange(2 * H, 3 * H)])
    # Pre-scale sigmoid-gate columns by 0.5 (exact in binary) so in-kernel
    # sigmoid(x) = 0.5 * tanh(gates_col) + 0.5 needs no extra scaling.
    col_scale = np.concatenate([np.full(3 * H, 0.5, np.float32),
                                np.ones(H, np.float32)])

    wih_sc = wih_t_ref[:, perm] * col_scale                  # (D, 4H) f32
    whh_sc = whh_t_ref[:, perm] * col_scale                  # (H, 4H) f32
    bias_p = (bias_ref[:, perm] * col_scale)                 # (1, 4H) f32

    wih_p = jnp.pad(wih_sc, ((0, d_pad - input_dim), (0, 0))).astype(jnp.bfloat16)
    whh_p = whh_sc.astype(jnp.bfloat16)
    wdec_p = jnp.pad(wdec_t, ((0, 0), (0, n_pad - 1))).astype(jnp.bfloat16)
    bdec_p = jnp.pad(bdec, ((0, 0), (0, n_pad - 1)))         # (1, 128) f32

    # Embedding table pre-padded to 128 cols and pre-cast to bf16 once; the
    # per-call gather then directly yields the padded bf16 kernel input.
    emb_pad = jnp.pad(embedding, ((0, 0), (0, d_pad - input_dim))).astype(jnp.bfloat16)

    # Per-call glue (plain JAX): gather + batch pad 8 -> 16 + flatten (T,Bp)->T*Bp.
    x_pad = jnp.take(emb_pad, x_in.T, axis=0)                # (T, B, 128) bf16
    x_pad = jnp.pad(x_pad, ((0, 0), (0, b_pad - batch), (0, 0)))
    x_flat = x_pad.reshape(seq_len * b_pad, d_pad)           # (T*Bp, 128) bf16

    h0_p = jnp.pad(h0, ((0, b_pad - batch), (0, 0)))         # (Bp, H) f32
    c0_p = jnp.pad(c0, ((0, b_pad - batch), (0, 0)))         # (Bp, H) f32

    out_pad = simple_lstm_forward(x_flat, h0_p, c0_p, wih_p, whh_p, bias_p,
                                  wdec_p, bdec_p)
    out_pad = jax.block_until_ready(out_pad)
    out = out_pad[:batch, :1]                                # (B, 1) f32

    ref = reference_forward(x_emb, h0, c0, wih_t_ref, whh_t_ref, bias_ref,
                            wdec_t, bdec)
    assert out.shape == (batch, 1)
    np.testing.assert_allclose(np.asarray(out), np.asarray(ref),
                               rtol=2e-2, atol=2e-2)

    print("KERNEL_OK")
</pallas_src>

<mosaic_0001>
module attributes {stable_mosaic.version = 11 : i64} {
  func.func @lstm_kernel(%arg0: memref<96x128xbf16, #tpu.memory_space<vmem>>, %arg1: memref<16x128xf32, #tpu.memory_space<vmem>>, %arg2: memref<16x128xf32, #tpu.memory_space<vmem>>, %arg3: memref<128x512xbf16, #tpu.memory_space<vmem>>, %arg4: memref<128x512xbf16, #tpu.memory_space<vmem>>, %arg5: memref<1x512xf32, #tpu.memory_space<vmem>>, %arg6: memref<128x128xbf16, #tpu.memory_space<vmem>>, %arg7: memref<1x128xf32, #tpu.memory_space<vmem>>, %arg8: memref<16x128xf32, #tpu.memory_space<vmem>>) attributes {dimension_semantics = [], scalar_prefetch = 0 : i64, scratch_operands = 0 : i64, tpu.core_type = #tpu.core_type<tc>} {
    %c0 = arith.constant 0 : index
    %c0_0 = arith.constant 0 : index
    %0 = vector.load %arg4[%c0, %c0_0] : memref<128x512xbf16, #tpu.memory_space<vmem>>, vector<128x512xbf16>
    %c0_1 = arith.constant 0 : index
    %c0_2 = arith.constant 0 : index
    %1 = vector.load %arg0[%c0_1, %c0_2] : memref<96x128xbf16, #tpu.memory_space<vmem>>, vector<96x128xbf16>
    %c0_3 = arith.constant 0 : index
    %c0_4 = arith.constant 0 : index
    %2 = vector.load %arg3[%c0_3, %c0_4] : memref<128x512xbf16, #tpu.memory_space<vmem>>, vector<128x512xbf16>
    %cst = arith.constant dense<0.000000e+00> : vector<96x512xf32>
    %3 = tpu.matmul %1, %2, %cst {dimension_numbers = #tpu.dot_dimension_numbers<[1], [0], [0], [1], [0, 0, 1, 1], [], []>} : vector<96x128xbf16>, vector<128x512xbf16>, vector<96x512xf32> -> vector<96x512xf32>
    %c0_5 = arith.constant 0 : index
    %c0_6 = arith.constant 0 : index
    %4 = vector.load %arg5[%c0_5, %c0_6] : memref<1x512xf32, #tpu.memory_space<vmem>>, vector<1x512xf32>
    %5 = vector.broadcast %4 : vector<1x512xf32> to vector<96x512xf32>
    %6 = arith.addf %3, %5 : vector<96x512xf32>
    %c0_7 = arith.constant 0 : index
    %c0_8 = arith.constant 0 : index
    %7 = vector.load %arg1[%c0_7, %c0_8] : memref<16x128xf32, #tpu.memory_space<vmem>>, vector<16x128xf32>
    %c0_9 = arith.constant 0 : index
    %c0_10 = arith.constant 0 : index
    %8 = vector.load %arg2[%c0_9, %c0_10] : memref<16x128xf32, #tpu.memory_space<vmem>>, vector<16x128xf32>
    %9 = vector.extract_strided_slice %6 {offsets = [0, 0], sizes = [16, 512], strides = [1, 1]} : vector<96x512xf32> to vector<16x512xf32>
    %10 = arith.truncf %7 : vector<16x128xf32> to vector<16x128xbf16>
    %cst_11 = arith.constant dense<0.000000e+00> : vector<16x512xf32>
    %11 = tpu.matmul %10, %0, %cst_11 {dimension_numbers = #tpu.dot_dimension_numbers<[1], [0], [0], [1], [0, 0, 1, 1], [], []>} : vector<16x128xbf16>, vector<128x512xbf16>, vector<16x512xf32> -> vector<16x512xf32>
    %12 = arith.addf %9, %11 : vector<16x512xf32>
    %13 = math.tanh %12 : vector<16x512xf32>
    %14 = vector.extract_strided_slice %13 {offsets = [0, 0], sizes = [16, 384], strides = [1, 1]} : vector<16x512xf32> to vector<16x384xf32>
    %cst_12 = arith.constant 5.000000e-01 : f32
    %15 = vector.broadcast %cst_12 : f32 to vector<16x384xf32>
    %16 = arith.mulf %15, %14 : vector<16x384xf32>
    %cst_13 = arith.constant 5.000000e-01 : f32
    %17 = vector.broadcast %cst_13 : f32 to vector<16x384xf32>
    %18 = arith.addf %16, %17 : vector<16x384xf32>
    %19 = vector.extract_strided_slice %18 {offsets = [0, 0], sizes = [16, 128], strides = [1, 1]} : vector<16x384xf32> to vector<16x128xf32>
    %20 = vector.extract_strided_slice %18 {offsets = [0, 128], sizes = [16, 128], strides = [1, 1]} : vector<16x384xf32> to vector<16x128xf32>
    %21 = vector.extract_strided_slice %18 {offsets = [0, 256], sizes = [16, 128], strides = [1, 1]} : vector<16x384xf32> to vector<16x128xf32>
    %22 = vector.extract_strided_slice %13 {offsets = [0, 384], sizes = [16, 128], strides = [1, 1]} : vector<16x512xf32> to vector<16x128xf32>
    %23 = arith.mulf %20, %8 : vector<16x128xf32>
    %24 = arith.mulf %19, %22 : vector<16x128xf32>
    %25 = arith.addf %23, %24 : vector<16x128xf32>
    %26 = math.tanh %25 : vector<16x128xf32>
    %27 = arith.mulf %21, %26 : vector<16x128xf32>
    %28 = math.tanh %27 : vector<16x128xf32>
    %29 = vector.extract_strided_slice %6 {offsets = [16, 0], sizes = [16, 512], strides = [1, 1]} : vector<96x512xf32> to vector<16x512xf32>
    %30 = arith.truncf %28 : vector<16x128xf32> to vector<16x128xbf16>
    %cst_14 = arith.constant dense<0.000000e+00> : vector<16x512xf32>
    %31 = tpu.matmul %30, %0, %cst_14 {dimension_numbers = #tpu.dot_dimension_numbers<[1], [0], [0], [1], [0, 0, 1, 1], [], []>} : vector<16x128xbf16>, vector<128x512xbf16>, vector<16x512xf32> -> vector<16x512xf32>
    %32 = arith.addf %29, %31 : vector<16x512xf32>
    %33 = math.tanh %32 : vector<16x512xf32>
    %34 = vector.extract_strided_slice %33 {offsets = [0, 0], sizes = [16, 384], strides = [1, 1]} : vector<16x512xf32> to vector<16x384xf32>
    %cst_15 = arith.constant 5.000000e-01 : f32
    %35 = vector.broadcast %cst_15 : f32 to vector<16x384xf32>
    %36 = arith.mulf %35, %34 : vector<16x384xf32>
    %cst_16 = arith.constant 5.000000e-01 : f32
    %37 = vector.broadcast %cst_16 : f32 to vector<16x384xf32>
    %38 = arith.addf %36, %37 : vector<16x384xf32>
    %39 = vector.extract_strided_slice %38 {offsets = [0, 0], sizes = [16, 128], strides = [1, 1]} : vector<16x384xf32> to vector<16x128xf32>
    %40 = vector.extract_strided_slice %38 {offsets = [0, 128], sizes = [16, 128], strides = [1, 1]} : vector<16x384xf32> to vector<16x128xf32>
    %41 = vector.extract_strided_slice %38 {offsets = [0, 256], sizes = [16, 128], strides = [1, 1]} : vector<16x384xf32> to vector<16x128xf32>
    %42 = vector.extract_strided_slice %33 {offsets = [0, 384], sizes = [16, 128], strides = [1, 1]} : vector<16x512xf32> to vector<16x128xf32>
    %43 = arith.mulf %40, %25 : vector<16x128xf32>
    %44 = arith.mulf %39, %42 : vector<16x128xf32>
    %45 = arith.addf %43, %44 : vector<16x128xf32>
    %46 = math.tanh %45 : vector<16x128xf32>
    %47 = arith.mulf %41, %46 : vector<16x128xf32>
    %48 = math.tanh %47 : vector<16x128xf32>
    %49 = vector.extract_strided_slice %6 {offsets = [32, 0], sizes = [16, 512], strides = [1, 1]} : vector<96x512xf32> to vector<16x512xf32>
    %50 = arith.truncf %48 : vector<16x128xf32> to vector<16x128xbf16>
    %cst_17 = arith.constant dense<0.000000e+00> : vector<16x512xf32>
    %51 = tpu.matmul %50, %0, %cst_17 {dimension_numbers = #tpu.dot_dimension_numbers<[1], [0], [0], [1], [0, 0, 1, 1], [], []>} : vector<16x128xbf16>, vector<128x512xbf16>, vector<16x512xf32> -> vector<16x512xf32>
    %52 = arith.addf %49, %51 : vector<16x512xf32>
    %53 = math.tanh %52 : vector<16x512xf32>
    %54 = vector.extract_strided_slice %53 {offsets = [0, 0], sizes = [16, 384], strides = [1, 1]} : vector<16x512xf32> to vector<16x384xf32>
    %cst_18 = arith.constant 5.000000e-01 : f32
    %55 = vector.broadcast %cst_18 : f32 to vector<16x384xf32>
    %56 = arith.mulf %55, %54 : vector<16x384xf32>
    %cst_19 = arith.constant 5.000000e-01 : f32
    %57 = vector.broadcast %cst_19 : f32 to vector<16x384xf32>
    %58 = arith.addf %56, %57 : vector<16x384xf32>
    %59 = vector.extract_strided_slice %58 {offsets = [0, 0], sizes = [16, 128], strides = [1, 1]} : vector<16x384xf32> to vector<16x128xf32>
    %60 = vector.extract_strided_slice %58 {offsets = [0, 128], sizes = [16, 128], strides = [1, 1]} : vector<16x384xf32> to vector<16x128xf32>
    %61 = vector.extract_strided_slice %58 {offsets = [0, 256], sizes = [16, 128], strides = [1, 1]} : vector<16x384xf32> to vector<16x128xf32>
    %62 = vector.extract_strided_slice %53 {offsets = [0, 384], sizes = [16, 128], strides = [1, 1]} : vector<16x512xf32> to vector<16x128xf32>
    %63 = arith.mulf %60, %45 : vector<16x128xf32>
    %64 = arith.mulf %59, %62 : vector<16x128xf32>
    %65 = arith.addf %63, %64 : vector<16x128xf32>
    %66 = math.tanh %65 : vector<16x128xf32>
    %67 = arith.mulf %61, %66 : vector<16x128xf32>
    %68 = math.tanh %67 : vector<16x128xf32>
    %69 = vector.extract_strided_slice %6 {offsets = [48, 0], sizes = [16, 512], strides = [1, 1]} : vector<96x512xf32> to vector<16x512xf32>
    %70 = arith.truncf %68 : vector<16x128xf32> to vector<16x128xbf16>
    %cst_20 = arith.constant dense<0.000000e+00> : vector<16x512xf32>
    %71 = tpu.matmul %70, %0, %cst_20 {dimension_numbers = #tpu.dot_dimension_numbers<[1], [0], [0], [1], [0, 0, 1, 1], [], []>} : vector<16x128xbf16>, vector<128x512xbf16>, vector<16x512xf32> -> vector<16x512xf32>
    %72 = arith.addf %69, %71 : vector<16x512xf32>
    %73 = math.tanh %72 : vector<16x512xf32>
    %74 = vector.extract_strided_slice %73 {offsets = [0, 0], sizes = [16, 384], strides = [1, 1]} : vector<16x512xf32> to vector<16x384xf32>
    %cst_21 = arith.constant 5.000000e-01 : f32
    %75 = vector.broadcast %cst_21 : f32 to vector<16x384xf32>
    %76 = arith.mulf %75, %74 : vector<16x384xf32>
    %cst_22 = arith.constant 5.000000e-01 : f32
    %77 = vector.broadcast %cst_22 : f32 to vector<16x384xf32>
    %78 = arith.addf %76, %77 : vector<16x384xf32>
    %79 = vector.extract_strided_slice %78 {offsets = [0, 0], sizes = [16, 128], strides = [1, 1]} : vector<16x384xf32> to vector<16x128xf32>
    %80 = vector.extract_strided_slice %78 {offsets = [0, 128], sizes = [16, 128], strides = [1, 1]} : vector<16x384xf32> to vector<16x128xf32>
    %81 = vector.extract_strided_slice %78 {offsets = [0, 256], sizes = [16, 128], strides = [1, 1]} : vector<16x384xf32> to vector<16x128xf32>
    %82 = vector.extract_strided_slice %73 {offsets = [0, 384], sizes = [16, 128], strides = [1, 1]} : vector<16x512xf32> to vector<16x128xf32>
    %83 = arith.mulf %80, %65 : vector<16x128xf32>
    %84 = arith.mulf %79, %82 : vector<16x128xf32>
    %85 = arith.addf %83, %84 : vector<16x128xf32>
    %86 = math.tanh %85 : vector<16x128xf32>
    %87 = arith.mulf %81, %86 : vector<16x128xf32>
    %88 = math.tanh %87 : vector<16x128xf32>
    %89 = vector.extract_strided_slice %6 {offsets = [64, 0], sizes = [16, 512], strides = [1, 1]} : vector<96x512xf32> to vector<16x512xf32>
    %90 = arith.truncf %88 : vector<16x128xf32> to vector<16x128xbf16>
    %cst_23 = arith.constant dense<0.000000e+00> : vector<16x512xf32>
    %91 = tpu.matmul %90, %0, %cst_23 {dimension_numbers = #tpu.dot_dimension_numbers<[1], [0], [0], [1], [0, 0, 1, 1], [], []>} : vector<16x128xbf16>, vector<128x512xbf16>, vector<16x512xf32> -> vector<16x512xf32>
    %92 = arith.addf %89, %91 : vector<16x512xf32>
    %93 = math.tanh %92 : vector<16x512xf32>
    %94 = vector.extract_strided_slice %93 {offsets = [0, 0], sizes = [16, 384], strides = [1, 1]} : vector<16x512xf32> to vector<16x384xf32>
    %cst_24 = arith.constant 5.000000e-01 : f32
    %95 = vector.broadcast %cst_24 : f32 to vector<16x384xf32>
    %96 = arith.mulf %95, %94 : vector<16x384xf32>
    %cst_25 = arith.constant 5.000000e-01 : f32
    %97 = vector.broadcast %cst_25 : f32 to vector<16x384xf32>
    %98 = arith.addf %96, %97 : vector<16x384xf32>
    %99 = vector.extract_strided_slice %98 {offsets = [0, 0], sizes = [16, 128], strides = [1, 1]} : vector<16x384xf32> to vector<16x128xf32>
    %100 = vector.extract_strided_slice %98 {offsets = [0, 128], sizes = [16, 128], strides = [1, 1]} : vector<16x384xf32> to vector<16x128xf32>
    %101 = vector.extract_strided_slice %98 {offsets = [0, 256], sizes = [16, 128], strides = [1, 1]} : vector<16x384xf32> to vector<16x128xf32>
    %102 = vector.extract_strided_slice %93 {offsets = [0, 384], sizes = [16, 128], strides = [1, 1]} : vector<16x512xf32> to vector<16x128xf32>
    %103 = arith.mulf %100, %85 : vector<16x128xf32>
    %104 = arith.mulf %99, %102 : vector<16x128xf32>
    %105 = arith.addf %103, %104 : vector<16x128xf32>
    %106 = math.tanh %105 : vector<16x128xf32>
    %107 = arith.mulf %101, %106 : vector<16x128xf32>
    %108 = math.tanh %107 : vector<16x128xf32>
    %109 = vector.extract_strided_slice %6 {offsets = [80, 0], sizes = [16, 512], strides = [1, 1]} : vector<96x512xf32> to vector<16x512xf32>
    %110 = arith.truncf %108 : vector<16x128xf32> to vector<16x128xbf16>
    %cst_26 = arith.constant dense<0.000000e+00> : vector<16x512xf32>
    %111 = tpu.matmul %110, %0, %cst_26 {dimension_numbers = #tpu.dot_dimension_numbers<[1], [0], [0], [1], [0, 0, 1, 1], [], []>} : vector<16x128xbf16>, vector<128x512xbf16>, vector<16x512xf32> -> vector<16x512xf32>
    %112 = arith.addf %109, %111 : vector<16x512xf32>
    %113 = math.tanh %112 : vector<16x512xf32>
    %114 = vector.extract_strided_slice %113 {offsets = [0, 0], sizes = [16, 384], strides = [1, 1]} : vector<16x512xf32> to vector<16x384xf32>
    %cst_27 = arith.constant 5.000000e-01 : f32
    %115 = vector.broadcast %cst_27 : f32 to vector<16x384xf32>
    %116 = arith.mulf %115, %114 : vector<16x384xf32>
    %cst_28 = arith.constant 5.000000e-01 : f32
    %117 = vector.broadcast %cst_28 : f32 to vector<16x384xf32>
    %118 = arith.addf %116, %117 : vector<16x384xf32>
    %119 = vector.extract_strided_slice %118 {offsets = [0, 0], sizes = [16, 128], strides = [1, 1]} : vector<16x384xf32> to vector<16x128xf32>
    %120 = vector.extract_strided_slice %118 {offsets = [0, 128], sizes = [16, 128], strides = [1, 1]} : vector<16x384xf32> to vector<16x128xf32>
    %121 = vector.extract_strided_slice %118 {offsets = [0, 256], sizes = [16, 128], strides = [1, 1]} : vector<16x384xf32> to vector<16x128xf32>
    %122 = vector.extract_strided_slice %113 {offsets = [0, 384], sizes = [16, 128], strides = [1, 1]} : vector<16x512xf32> to vector<16x128xf32>
    %123 = arith.mulf %120, %105 : vector<16x128xf32>
    %124 = arith.mulf %119, %122 : vector<16x128xf32>
    %125 = arith.addf %123, %124 : vector<16x128xf32>
    %126 = math.tanh %125 : vector<16x128xf32>
    %127 = arith.mulf %121, %126 : vector<16x128xf32>
    %128 = math.tanh %127 : vector<16x128xf32>
    %129 = arith.truncf %128 : vector<16x128xf32> to vector<16x128xbf16>
    %c0_29 = arith.constant 0 : index
    %c0_30 = arith.constant 0 : index
    %130 = vector.load %arg6[%c0_29, %c0_30] : memref<128x128xbf16, #tpu.memory_space<vmem>>, vector<128x128xbf16>
    %cst_31 = arith.constant dense<0.000000e+00> : vector<16x128xf32>
    %131 = tpu.matmul %129, %130, %cst_31 {dimension_numbers = #tpu.dot_dimension_numbers<[1], [0], [0], [1], [0, 0, 1, 1], [], []>} : vector<16x128xbf16>, vector<128x128xbf16>, vector<16x128xf32> -> vector<16x128xf32>
    %c0_32 = arith.constant 0 : index
    %c0_33 = arith.constant 0 : index
    %132 = vector.load %arg7[%c0_32, %c0_33] : memref<1x128xf32, #tpu.memory_space<vmem>>, vector<1x128xf32>
    %133 = vector.broadcast %132 : vector<1x128xf32> to vector<16x128xf32>
    %134 = arith.addf %131, %133 : vector<16x128xf32>
    %c0_34 = arith.constant 0 : index
    %c0_35 = arith.constant 0 : index
    %135 = vector.load %arg8[%c0_34, %c0_35] : memref<16x128xf32, #tpu.memory_space<vmem>>, vector<16x128xf32>
    tpu.vector_store %arg8[%c0_34, %c0_35], %134 {strides = array<i32>} : memref<16x128xf32, #tpu.memory_space<vmem>>, vector<16x128xf32>,
    return
  }
}

</mosaic_0001>

<bundles_post_ra>
// kernel: tpu_custom_call.1
= control target key start
LH: loop header
LB: loop body
LE: loop exit
PB: predicated region body
PF: predicated region fallthrough
CT: control target
= control target key end

     0   :  { %13 = vsyncpa [#allocation3], 0  ;;  %s2716_s0 = inlined_call_operand.hbm [shape: bf16[96,128], index: 0, kind: input, shape index: {}]   ;;  %s2717_s1 = inlined_call_operand.hbm [shape: f32[16,128], index: 1, kind: input, shape index: {}]   ;;  %s2718_s2 = inlined_call_operand.hbm [shape: f32[16,128], index: 2, kind: input, shape index: {}]   ;;  %s2719_s3 = inlined_call_operand.hbm [shape: bf16[128,512], index: 3, kind: input, shape index: {}]   ;;  %s2720_s4 = inlined_call_operand.hbm [shape: bf16[128,512], index: 4, kind: input, shape index: {}]   ;;  %s2721_s5 = inlined_call_operand.vmem [shape: f32[1,512], index: 5, kind: input, shape index: {}]   ;;  %s2722_s6 = inlined_call_operand.hbm [shape: bf16[128,128], index: 6, kind: input, shape index: {}]   ;;  %s2723_s7 = inlined_call_operand.vmem [shape: f32[1,128], index: 7, kind: input, shape index: {}]   ;;  %s2724_s8 = inlined_call_operand.hbm [shape: f32[16,128], index: 8, kind: output, shape index: {}]  }
   0x1   :  { %14 = vsyncpa [#allocation6], 0 }
   0x2   :  { %15 = vsyncpa [#allocation9], 0 }
   0x3   :  { %16 = vsyncpa [#allocation12], 0  ;;  %s35_s29 = sshll.u32 %s2717_s1, 4  ;;  %s36_s29 = int_to_ptr.hbm [resolvable:$true] %s35_s29 }
   0x4   :  { %17 = vsyncpa [#allocation4], 0  ;;  %s2141_s30 = smov [#allocation5]   ;;  %s61_s12 = sshll.u32 %s2719_s3, 4  ;;  %s62_s12 = int_to_ptr.hbm [resolvable:$true] %s61_s12 }
   0x5   :  { %s37_s9 = sshll.u32 %s2141_s30, 4  ;;  %s2142_s13 = smov 128   ;;  %s38_s9 = int_to_ptr.vmem [resolvable:$true] %s37_s9 }
   0x6   :  { %s2143_s14 = smov 8   ;;  %s2144_s15 = smov [#allocation8]  }
   0x7   :  { %43 = dma.hbm_to_vmem [thread:$0]  %s36_s29, 256, %s38_s9, [#allocation6], %s2142_s13, %s2142_s13, %s2143_s14  }
   0x8   :  { %s63_s16 = sshll.u32 %s2144_s15, 4  ;;  %s2145_s1 = smov 256   ;;  %s64_s16 = int_to_ptr.vmem [resolvable:$true] %s63_s16 }
   0x9   :  { %s2146_s17 = smov 16   ;;  %s22_s20 = sshll.u32 %s2716_s0, 4  ;;  %s23_s20 = int_to_ptr.hbm [resolvable:$true] %s22_s20 }
   0xa   :  { %69 = dma.hbm_to_vmem [thread:$0]  %s62_s12, 4096, %s64_s16, [#allocation9], %s2145_s1, %s2145_s1, %s2146_s17  }
   0xb   :  { %s2147_s21 = smov [#allocation2]   ;;  %s48_s24 = sshll.u32 %s2718_s2, 4  ;;  %s49_s24 = int_to_ptr.hbm [resolvable:$true] %s48_s24 }
   0xc   :  { %s24_s3 = sshll.u32 %s2147_s21, 4  ;;  %s2148_s25 = smov 64   ;;  %s25_s3 = int_to_ptr.vmem [resolvable:$true] %s24_s3 }
   0xd   :  { %s2149_s26 = smov 4   ;;  %s2150_s27 = smov [#allocation7]  }
   0xe   :  { %30 = dma.hbm_to_vmem [thread:$0]  %s23_s20, 768, %s25_s3, [#allocation3], %s2148_s25, %s2148_s25, %s2149_s26  }
   0xf   :  { %s50_s28 = sshll.u32 %s2150_s27, 4  ;;  %s74_s9 = sshll.u32 %s2720_s4, 4  ;;  %s51_s28 = int_to_ptr.vmem [resolvable:$true] %s50_s28  ;;  %s75_s9 = int_to_ptr.hbm [resolvable:$true] %s74_s9 }
  0x10   :  { %56 = dma.hbm_to_vmem [thread:$0]  %s49_s24, 256, %s51_s28, [#allocation6], %s2142_s13, %s2142_s13, %s2143_s14  }
  0x11   :  { %s89_s2 = sshll.u32 %s2722_s6, 4  ;;  %s2151_s11 = smov [#allocation10]   ;;  %s90_s2 = int_to_ptr.hbm [resolvable:$true] %s89_s2 }
  0x12   :  { %s76_s12 = sshll.u32 %s2151_s11, 4  ;;  %s2152_s15 = smov [#allocation11]   ;;  %s77_s12 = int_to_ptr.vmem [resolvable:$true] %s76_s12 }
  0x13   :  { %82 = dma.hbm_to_vmem [thread:$0]  %s75_s9, 4096, %s77_s12, [#allocation9], %s2145_s1, %s2145_s1, %s2146_s17  }
  0x14   :  { %s91_s16 = sshll.u32 %s2152_s15, 4  ;;  %s92_s16 = int_to_ptr.vmem [resolvable:$true] %s91_s16 }
  0x15   :  { %97 = dma.hbm_to_vmem [thread:$0]  %s90_s2, 1024, %s92_s16, [#allocation12], %s2148_s25, %s2148_s25, %s2149_s26  }
  0x16   :  { %2131 = dma.done.wait [#allocation3], 768  }
  0x17   :  { %2132 = vsyncadd [#allocation3], 4294966528 }
  0x18   :  { %2133 = dma.done.wait [#allocation6], 512  }
  0x19   :  { %2134 = vsyncadd [#allocation6], 4294966784 }
  0x1a   :  { %2135 = dma.done.wait [#allocation9], 8192  }
  0x1b   :  { %2136 = vsyncadd [#allocation9], 4294959104 }
  0x1c   :  { %2137 = dma.done.wait [#allocation12], 1024  }
  0x1d   :  { %2138 = vsyncadd [#allocation12], 4294966272  ;;  %v1553_v0 = vld [vmem:[#allocation8 + $0xe0] sm:$0xf]  ;;  %v1795_v1 = vld [vmem:[#allocation8 + $0xec] sm:$0xf0] }
  0x1e   :  { %v1793_v2 = vld [vmem:[#allocation8 + $0xe4] sm:$0xf]  ;;  %v1554_v3 = vor.u32 %v1795_v1, %v1553_v0  ;;  %v1555_v4 = vld [vmem:[#allocation8 + $0xf0] sm:$0xf0]  ;;  %v1561_v5 = vld [vmem:[#allocation8 + $0xe8] sm:$0xf] }
  0x1f   :  { %v1796_v6 = vld [vmem:[#allocation8 + $0xf4] sm:$0xf0]  ;;  %v1558_v7 = vor.u32 %v1793_v2, %v1555_v4  ;;  %v1794_v9 = vld [vmem:[#allocation8 + $0xec] sm:$0xf]  ;;  %v1563_v10 = vld [vmem:[#allocation8 + $0xf8] sm:$0xf0] }
  0x20   :  { %v1562_v8 = vor.u32 %v1796_v6, %v1561_v5  ;;  %v1537_v11 = vld [vmem:[#allocation8 + $0xc0] sm:$0xf]  ;;  %406 = vmatpush.bf16.msra.mxu0 %v1554_v3  ;;  %v1566_v12 = vor.u32 %v1794_v9, %v1563_v10  ;;  %v1791_v13 = vld [vmem:[#allocation8 + $0xcc] sm:$0xf0]  ;;  %v1789_v14 = vld [vmem:[#allocation8 + $0xc4] sm:$0xf] }
  0x21   :  { %v1539_v15 = vld [vmem:[#allocation8 + $0xd0] sm:$0xf0]  ;;  %445 = vmatpush.bf16.msra.mxu1 %v1558_v7  ;;  %v1538_v16 = vor.u32 %v1791_v13, %v1537_v11  ;;  %v1545_v18 = vld [vmem:[#allocation8 + $0xc8] sm:$0xf]  ;;  %v1792_v19 = vld [vmem:[#allocation8 + $0xd4] sm:$0xf0] }
  0x22   :  { %484 = vmatpush.bf16.msra.mxu2 %v1562_v8  ;;  %v1542_v17 = vor.u32 %v1789_v14, %v1539_v15  ;;  %v1790_v20 = vld [vmem:[#allocation8 + $0xcc] sm:$0xf]  ;;  %523 = vmatpush.bf16.msra.mxu3 %v1566_v12  ;;  %v1546_v21 = vor.u32 %v1792_v19, %v1545_v18  ;;  %v1547_v22 = vld [vmem:[#allocation8 + $0xd8] sm:$0xf0]  ;;  %v1521_v23 = vld [vmem:[#allocation8 + $0xa0] sm:$0xf] }
  0x23   :  { %v1787_v24 = vld [vmem:[#allocation8 + $0xac] sm:$0xf0]  ;;  %v1550_v25 = vor.u32 %v1790_v20, %v1547_v22  ;;  %v1785_v26 = vld [vmem:[#allocation8 + $0xa4] sm:$0xf]  ;;  %v1523_v27 = vld [vmem:[#allocation8 + $0xb0] sm:$0xf0] }
  0x24   :  { %v1529_v28 = vld [vmem:[#allocation8 + $0xa8] sm:$0xf]  ;;  %407 = vmatpush.bf16.msra.mxu0 %v1538_v16  ;;  %v1522_v29 = vor.u32 %v1787_v24, %v1521_v23  ;;  %v1788_v30 = vld [vmem:[#allocation8 + $0xb4] sm:$0xf0]  ;;  %v1786_v31 = vld [vmem:[#allocation8 + $0xac] sm:$0xf]  ;;  %v1526_v33 = vor.u32 %v1785_v26, %v1523_v27 }
  0x25   :  { %v1531_v32 = vld [vmem:[#allocation8 + $0xb8] sm:$0xf0]  ;;  %446 = vmatpush.bf16.msra.mxu1 %v1542_v17  ;;  %v1530_v34 = vor.u32 %v1788_v30, %v1529_v28  ;;  %v1505_v35 = vld [vmem:[#allocation8 + $0x80] sm:$0xf]  ;;  %v1783_v36 = vld [vmem:[#allocation8 + $0x8c] sm:$0xf0] }
  0x26   :  { %485 = vmatpush.bf16.msra.mxu2 %v1546_v21  ;;  %v1781_v37 = vld [vmem:[#allocation8 + $0x84] sm:$0xf]  ;;  %524 = vmatpush.bf16.msra.mxu3 %v1550_v25  ;;  %v1534_v38 = vor.u32 %v1786_v31, %v1531_v32  ;;  %v1507_v39 = vld [vmem:[#allocation8 + $0x90] sm:$0xf0]  ;;  %v1513_v40 = vld [vmem:[#allocation8 + $0x88] sm:$0xf]  ;;  %v1506_v44 = vor.u32 %v1783_v36, %v1505_v35 }
  0x27   :  { %v1784_v41 = vld [vmem:[#allocation8 + $0x94] sm:$0xf0]  ;;  %v1782_v42 = vld [vmem:[#allocation8 + $0x8c] sm:$0xf]  ;;  %v1515_v43 = vld [vmem:[#allocation8 + $0x98] sm:$0xf0]  ;;  %v1510_v45 = vor.u32 %v1781_v37, %v1507_v39 }
  0x28   :  { %408 = vmatpush.bf16.msra.mxu0 %v1522_v29  ;;  %v1514_v46 = vor.u32 %v1784_v41, %v1513_v40  ;;  %v1489_v47 = vld [vmem:[#allocation8 + $0x60] sm:$0xf]  ;;  %v1779_v48 = vld [vmem:[#allocation8 + $0x6c] sm:$0xf0]  ;;  %v1777_v49 = vld [vmem:[#allocation8 + $0x64] sm:$0xf]  ;;  %v1518_v50 = vor.u32 %v1782_v42, %v1515_v43 }
  0x29   :  { %447 = vmatpush.bf16.msra.mxu1 %v1526_v33  ;;  %v1491_v51 = vld [vmem:[#allocation8 + $0x70] sm:$0xf0]  ;;  %v1497_v52 = vld [vmem:[#allocation8 + $0x68] sm:$0xf]  ;;  %v1780_v53 = vld [vmem:[#allocation8 + $0x74] sm:$0xf0]  ;;  %v1490_v56 = vor.u32 %v1779_v48, %v1489_v47 }
  0x2a   :  { %486 = vmatpush.bf16.msra.mxu2 %v1530_v34  ;;  %525 = vmatpush.bf16.msra.mxu3 %v1534_v38  ;;  %v1778_v54 = vld [vmem:[#allocation8 + $0x6c] sm:$0xf]  ;;  %v1499_v55 = vld [vmem:[#allocation8 + $0x78] sm:$0xf0]  ;;  %v1494_v57 = vor.u32 %v1777_v49, %v1491_v51  ;;  %v1498_v58 = vor.u32 %v1780_v53, %v1497_v52  ;;  %v1473_v59 = vld [vmem:[#allocation8 + $0x40] sm:$0xf] }
  0x2b   :  { %v1775_v60 = vld [vmem:[#allocation8 + $0x4c] sm:$0xf0]  ;;  %v1773_v61 = vld [vmem:[#allocation8 + $0x44] sm:$0xf]  ;;  %v1502_v62 = vor.u32 %v1778_v54, %v1499_v55  ;;  %v1475_v63 = vld [vmem:[#allocation8 + $0x50] sm:$0xf0] }
  0x2c   :  { %409 = vmatpush.bf16.msra.mxu0 %v1506_v44  ;;  %v1481_v0 = vld [vmem:[#allocation8 + $0x48] sm:$0xf]  ;;  %v1776_v1 = vld [vmem:[#allocation8 + $0x54] sm:$0xf0]  ;;  %v1774_v2 = vld [vmem:[#allocation8 + $0x4c] sm:$0xf]  ;;  %v1474_v4 = vor.u32 %v1775_v60, %v1473_v59  ;;  %v1478_v5 = vor.u32 %v1773_v61, %v1475_v63 }
  0x2d   :  { %448 = vmatpush.bf16.msra.mxu1 %v1510_v45  ;;  %v1483_v3 = vld [vmem:[#allocation8 + $0x58] sm:$0xf0]  ;;  %v1482_v6 = vor.u32 %v1776_v1, %v1481_v0  ;;  %v1457_v7 = vld [vmem:[#allocation8 + $0x20] sm:$0xf]  ;;  %v1771_v8 = vld [vmem:[#allocation8 + $0x2c] sm:$0xf0] }
  0x2e   :  { %487 = vmatpush.bf16.msra.mxu2 %v1514_v46  ;;  %526 = vmatpush.bf16.msra.mxu3 %v1518_v50  ;;  %v1769_v9 = vld [vmem:[#allocation8 + $0x24] sm:$0xf]  ;;  %v1486_v10 = vor.u32 %v1774_v2, %v1483_v3  ;;  %v1459_v11 = vld [vmem:[#allocation8 + $0x30] sm:$0xf0]  ;;  %v1465_v12 = vld [vmem:[#allocation8 + $0x28] sm:$0xf]  ;;  %v1458_v16 = vor.u32 %v1771_v8, %v1457_v7 }
  0x2f   :  { %v1772_v13 = vld [vmem:[#allocation8 + $0x34] sm:$0xf0]  ;;  %v1770_v14 = vld [vmem:[#allocation8 + $0x2c] sm:$0xf]  ;;  %v1467_v15 = vld [vmem:[#allocation8 + $0x38] sm:$0xf0]  ;;  %v1462_v18 = vor.u32 %v1769_v9, %v1459_v11 }
  0x30   :  { %410 = vmatpush.bf16.msra.mxu0 %v1490_v56  ;;  %v1441_v17 = vld [vmem:[#allocation8] sm:$0xf]  ;;  %v1466_v19 = vor.u32 %v1772_v13, %v1465_v12  ;;  %v1767_v20 = vld [vmem:[#allocation8 + $0xc] sm:$0xf0]  ;;  %v1765_v21 = vld [vmem:[#allocation8 + $0x4] sm:$0xf]  ;;  %v1470_v23 = vor.u32 %v1770_v14, %v1467_v15 }
  0x31   :  { %449 = vmatpush.bf16.msra.mxu1 %v1494_v57  ;;  %v1443_v22 = vld [vmem:[#allocation8 + $0x10] sm:$0xf0]  ;;  %v1449_v24 = vld [vmem:[#allocation8 + $0x8] sm:$0xf]  ;;  %v1768_v25 = vld [vmem:[#allocation8 + $0x14] sm:$0xf0]  ;;  %v1442_v30 = vor.u32 %v1767_v20, %v1441_v17 }
  0x32   :  { %488 = vmatpush.bf16.msra.mxu2 %v1498_v58  ;;  %527 = vmatpush.bf16.msra.mxu3 %v1502_v62  ;;  %v1766_v26 = vld [vmem:[#allocation8 + $0xc] sm:$0xf]  ;;  %v1451_v27 = vld [vmem:[#allocation8 + $0x18] sm:$0xf0]  ;;  %v1681_v28 = vld [vmem:[#allocation10 + $0xe0] sm:$0xf]  ;;  %v1446_v33 = vor.u32 %v1765_v21, %v1443_v22  ;;  %v1450_v34 = vor.u32 %v1768_v25, %v1449_v24 }
  0x33   :  { %v1757_v29 = vld [vmem:[#allocation10 + $0xec] sm:$0xf0]  ;;  %v1756_v31 = vld [vmem:[#allocation10 + $0xec] sm:$0xf]  ;;  %v1691_v32 = vld [vmem:[#allocation10 + $0xf8] sm:$0xf0]  ;;  %v1454_v37 = vor.u32 %v1766_v26, %v1451_v27 }
  0x34   :  { %411 = vmatpush.bf16.msra.mxu0 %v1474_v4  ;;  %v1759_v35 = vld [vmem:[#allocation2] sm:$0xff]  ;;  %v1755_v36 = vld [vmem:[#allocation10 + $0xe4] sm:$0xf]  ;;  %v2223_v38 = vor.u32 %v1757_v29, %v1681_v28  ;;  %v1689_v40 = vld [vmem:[#allocation10 + $0xe8] sm:$0xf]  ;;  %v2225_v42 = vor.u32 %v1756_v31, %v1691_v32  ;;  %s2153_s17 = smov [#allocation13]  }
  0x35   :  { %450 = vmatpush.bf16.msra.mxu1 %v1478_v5  ;;  %v1683_v39 = vld [vmem:[#allocation10 + $0xf0] sm:$0xf0]  ;;  %v1758_v41 = vld [vmem:[#allocation10 + $0xf4] sm:$0xf0]  ;;  %v1665_v43 = vld [vmem:[#allocation10 + $0xc0] sm:$0xf] }
  0x36   :  { %489 = vmatpush.bf16.msra.mxu2 %v1482_v6  ;;  %528 = vmatpush.bf16.msra.mxu3 %v1486_v10  ;;  %v1753_v44 = vld [vmem:[#allocation10 + $0xcc] sm:$0xf0]  ;;  %v1752_v45 = vld [vmem:[#allocation10 + $0xcc] sm:$0xf]  ;;  %v1675_v46 = vld [vmem:[#allocation10 + $0xd8] sm:$0xf0]  ;;  %v2227_v47 = vor.u32 %v1755_v36, %v1683_v39  ;;  %v2230_v48 = vor.u32 %v1758_v41, %v1689_v40 }
  0x37   :  { %v2232_v49 = vor.u32 %v1753_v44, %v1665_v43  ;;  %v1751_v50 = vld [vmem:[#allocation10 + $0xc4] sm:$0xf]  ;;  %v1667_v51 = vld [vmem:[#allocation10 + $0xd0] sm:$0xf0]  ;;  %v1673_v52 = vld [vmem:[#allocation10 + $0xc8] sm:$0xf]  ;;  %v2235_v53 = vor.u32 %v1752_v45, %v1675_v46 }
  0x38   :  { %412 = vmatpush.bf16.msra.mxu0 %v1458_v16  ;;  %v1754_v54 = vld [vmem:[#allocation10 + $0xd4] sm:$0xf0]  ;;  %v1649_v55 = vld [vmem:[#allocation10 + $0xa0] sm:$0xf]  ;;  %v1749_v56 = vld [vmem:[#allocation10 + $0xac] sm:$0xf0]  ;;  %v2238_v59 = vor.u32 %v1751_v50, %v1667_v51 }
  0x39   :  { %451 = vmatpush.bf16.msra.mxu1 %v1462_v18  ;;  %v1748_v57 = vld [vmem:[#allocation10 + $0xac] sm:$0xf]  ;;  %v1659_v58 = vld [vmem:[#allocation10 + $0xb8] sm:$0xf0]  ;;  %v2242_v60 = vor.u32 %v1754_v54, %v1673_v52  ;;  %v2244_v61 = vor.u32 %v1749_v56, %v1649_v55  ;;  %v1747_v62 = vld [vmem:[#allocation10 + $0xa4] sm:$0xf] }
  0x3a   :  { %490 = vmatpush.bf16.msra.mxu2 %v1466_v19  ;;  %529 = vmatpush.bf16.msra.mxu3 %v1470_v23  ;;  %v1651_v63 = vld [vmem:[#allocation10 + $0xb0] sm:$0xf0]  ;;  %v1657_v0 = vld [vmem:[#allocation10 + $0xa8] sm:$0xf]  ;;  %v2247_v1 = vor.u32 %v1748_v57, %v1659_v58  ;;  %v1750_v2 = vld [vmem:[#allocation10 + $0xb4] sm:$0xf0] }
  0x3b   :  { %v1633_v3 = vld [vmem:[#allocation10 + $0x80] sm:$0xf]  ;;  %v1745_v4 = vld [vmem:[#allocation10 + $0x8c] sm:$0xf0]  ;;  %v1744_v5 = vld [vmem:[#allocation10 + $0x8c] sm:$0xf]  ;;  %v2250_v7 = vor.u32 %v1747_v62, %v1651_v63  ;;  %v2254_v8 = vor.u32 %v1750_v2, %v1657_v0 }
  0x3c   :  { %413 = vmatpush.bf16.msra.mxu0 %v1442_v30  ;;  %v1643_v6 = vld [vmem:[#allocation10 + $0x98] sm:$0xf0]  ;;  %v2256_v9 = vor.u32 %v1745_v4, %v1633_v3  ;;  %v1743_v10 = vld [vmem:[#allocation10 + $0x84] sm:$0xf]  ;;  %v1635_v11 = vld [vmem:[#allocation10 + $0x90] sm:$0xf0] }
  0x3d   :  { %452 = vmatpush.bf16.msra.mxu1 %v1446_v33  ;;  %v2259_v12 = vor.u32 %v1744_v5, %v1643_v6  ;;  %v1641_v13 = vld [vmem:[#allocation10 + $0x88] sm:$0xf]  ;;  %v1746_v14 = vld [vmem:[#allocation10 + $0x94] sm:$0xf0]  ;;  %v2262_v15 = vor.u32 %v1743_v10, %v1635_v11  ;;  %v1740_v18 = vld [vmem:[#allocation10 + $0x6c] sm:$0xf] }
  0x3e   :  { %491 = vmatpush.bf16.msra.mxu2 %v1450_v34  ;;  %530 = vmatpush.bf16.msra.mxu3 %v1454_v37  ;;  %v2266_v16 = vor.u32 %v1746_v14, %v1641_v13  ;;  %v1760_v17 = vld [vmem:[#allocation2 + $0x8] sm:$0xff]  ;;  %v1617_v20 = vld [vmem:[#allocation10 + $0x60] sm:$0xf]  ;;  %v1741_v22 = vld [vmem:[#allocation10 + $0x6c] sm:$0xf0]  ;;  %s1397_s18 = sshll.u32 %s2153_s17, 4  ;;  %s1398_s18 = int_to_ptr.vmem [resolvable:$true] %s1397_s18 }
  0x3f   :  { %414 = vmatmul.bf16.vlgmr.msra.gmra.mxu0 %v1759_v35  ;;  %v1627_v19 = vld [vmem:[#allocation10 + $0x78] sm:$0xf0]  ;;  %v1739_v23 = vld [vmem:[#allocation10 + $0x64] sm:$0xf]  ;;  %v1619_v24 = vld [vmem:[#allocation10 + $0x70] sm:$0xf0]  ;;  %v2273_v25 = vor.u32 %v1741_v22, %v1617_v20 }
  0x40   :  { %727 = vmatpush.bf16.msrb.mxu0 %v2223_v38  ;;  %453 = vmatmul.bf16.vlgmr.msra.gmra.mxu1 %v1759_v35  ;;  %v2271_v21 = vor.u32 %v1740_v18, %v1627_v19  ;;  %v2275_v26 = vor.u32 %v1739_v23, %v1619_v24  ;;  %v1625_v27 = vld [vmem:[#allocation10 + $0x68] sm:$0xf]  ;;  %v1742_v28 = vld [vmem:[#allocation10 + $0x74] sm:$0xf0]  ;;  %v1736_v29 = vld [vmem:[#allocation10 + $0x4c] sm:$0xf] }
  0x41   :  { %492 = vmatmul.bf16.vlgmr.msra.gmra.mxu2 %v1759_v35  ;;  %531 = vmatmul.bf16.vlgmr.msra.gmra.mxu3 %v1759_v35  ;;  %v2278_v30 = vor.u32 %v1742_v28, %v1625_v27  ;;  %v1611_v31 = vld [vmem:[#allocation10 + $0x58] sm:$0xf0]  ;;  %v1601_v32 = vld [vmem:[#allocation10 + $0x40] sm:$0xf]  ;;  %v1737_v33 = vld [vmem:[#allocation10 + $0x4c] sm:$0xf0] }
  0x42   :  { %769 = vmatpush.bf16.msrb.mxu3 %v2225_v42  ;;  %741 = vmatpush.bf16.msrb.mxu1 %v2227_v47  ;;  %v2282_v34 = vor.u32 %v1736_v29, %v1611_v31  ;;  %v2284_v35 = vor.u32 %v1737_v33, %v1601_v32  ;;  %v1735_v36 = vld [vmem:[#allocation10 + $0x44] sm:$0xf]  ;;  %v1603_v37 = vld [vmem:[#allocation10 + $0x50] sm:$0xf0]  ;;  %v1609_v41 = vld [vmem:[#allocation10 + $0x48] sm:$0xf] }
  0x43   :  { %755 = vmatpush.bf16.msrb.mxu2 %v2230_v48  ;;  %v2287_v39 = vor.u32 %v1735_v36, %v1603_v37  ;;  %v1761_v40 = vld [vmem:[#allocation2 + $0x10] sm:$0xff]  ;;  %v1738_v43 = vld [vmem:[#allocation10 + $0x54] sm:$0xf0]  ;;  %v1732_v44 = vld [vmem:[#allocation10 + $0x2c] sm:$0xf]  ;;  %s1399_s21 = sshll.u32 %s2724_s8, 4  ;;  %s1400_s21 = int_to_ptr.hbm [resolvable:$true] %s1399_s21 }
  0x44   :  { %728 = vmatpush.bf16.msrb.mxu0 %v2232_v49  ;;  %v2292_v45 = vor.u32 %v1738_v43, %v1609_v41  ;;  %v1595_v46 = vld [vmem:[#allocation10 + $0x38] sm:$0xf0]  ;;  %v1585_v50 = vld [vmem:[#allocation10 + $0x20] sm:$0xf]  ;;  %v1733_v51 = vld [vmem:[#allocation10 + $0x2c] sm:$0xf0] }
  0x45   :  { %v2294_v52 = vor.u32 %v1732_v44, %v1595_v46  ;;  %v2296_v54 = vor.u32 %v1733_v51, %v1585_v50  ;;  %v1731_v55 = vld [vmem:[#allocation10 + $0x24] sm:$0xf]  ;;  %v1587_v56 = vld [vmem:[#allocation10 + $0x30] sm:$0xf0]  ;;  %v1593_v57 = vld [vmem:[#allocation10 + $0x28] sm:$0xf] }
  0x46   :  { %770 = vmatpush.bf16.msrb.mxu3 %v2235_v53  ;;  %742 = vmatpush.bf16.msrb.mxu1 %v2238_v59  ;;  %v2299_v58 = vor.u32 %v1731_v55, %v1587_v56  ;;  %v1734_v62 = vld [vmem:[#allocation10 + $0x34] sm:$0xf0]  ;;  %v1762_v0 = vld [vmem:[#allocation2 + $0x18] sm:$0xff]  ;;  %v1579_v3 = vld [vmem:[#allocation10 + $0x18] sm:$0xf0] }
  0x47   :  { %756 = vmatpush.bf16.msrb.mxu2 %v2242_v60  ;;  %v2303_v63 = vor.u32 %v1734_v62, %v1593_v57  ;;  %v1728_v2 = vld [vmem:[#allocation10 + $0xc] sm:$0xf]  ;;  %v1569_v4 = vld [vmem:[#allocation10] sm:$0xf]  ;;  %v1729_v6 = vld [vmem:[#allocation10 + $0xc] sm:$0xf0] }
  0x48   :  { %729 = vmatpush.bf16.msrb.mxu0 %v2244_v61  ;;  %v2307_v5 = vor.u32 %v1728_v2, %v1579_v3  ;;  %v1727_v10 = vld [vmem:[#allocation10 + $0x4] sm:$0xf]  ;;  %v1571_v11 = vld [vmem:[#allocation10 + $0x10] sm:$0xf0]  ;;  %v2309_v13 = vor.u32 %v1729_v6, %v1569_v4  ;;  %v1730_v18 = vld [vmem:[#allocation10 + $0x14] sm:$0xf0] }
  0x49   :  { %v2311_v14 = vor.u32 %v1727_v10, %v1571_v11  ;;  %v1763_v20 = vld [vmem:[#allocation2 + $0x20] sm:$0xff]  ;;  %v1764_v22 = vld [vmem:[#allocation2 + $0x28] sm:$0xff]  ;;  %v562_v23 = vld [vmem:[#allocation5] sm:$0xff] }
  0x4a   :  { %771 = vmatpush.bf16.msrb.mxu3 %v2247_v1  ;;  %743 = vmatpush.bf16.msrb.mxu1 %v2250_v7  ;;  %v563_v24 = vld [vmem:[#allocation5 + $0x8] sm:$0xff] }
  0x4b   :  { %757 = vmatpush.bf16.msrb.mxu2 %v2254_v8  ;;  %v566_v27 = vpack.c.bf16 %v563_v24, %v562_v23 }
  0x4c   :  { %730 = vmatpush.bf16.msrb.mxu0 %v2256_v9 }
  0x4e   :  { %772 = vmatpush.bf16.msrb.mxu3 %v2259_v12  ;;  %744 = vmatpush.bf16.msrb.mxu1 %v2262_v15 }
  0x4f   :  { %758 = vmatpush.bf16.msrb.mxu2 %v2266_v16  ;;  %419 = vmatmul.bf16.gmra.mxu0 %v1760_v17 }
  0x50   :  { %458 = vmatmul.bf16.gmra.mxu1 %v1760_v17  ;;  %731 = vmatpush.bf16.msrb.mxu0 %v2273_v25 }
  0x51   :  { %497 = vmatmul.bf16.gmra.mxu2 %v1760_v17  ;;  %536 = vmatmul.bf16.gmra.mxu3 %v1760_v17  ;;  %v1577_v17 = vld [vmem:[#allocation10 + $0x8] sm:$0xf] }
  0x52   :  { %773 = vmatpush.bf16.msrb.mxu3 %v2271_v21  ;;  %745 = vmatpush.bf16.msrb.mxu1 %v2275_v26  ;;  %v2314_v19 = vor.u32 %v1730_v18, %v1577_v17 }
  0x53   :  { %759 = vmatpush.bf16.msrb.mxu2 %v2278_v30 }
  0x54   :  { %732 = vmatpush.bf16.msrb.mxu0 %v2284_v35 }
  0x56   :  { %774 = vmatpush.bf16.msrb.mxu3 %v2282_v34  ;;  %746 = vmatpush.bf16.msrb.mxu1 %v2287_v39 }
  0x57   :  { %760 = vmatpush.bf16.msrb.mxu2 %v2292_v45 }
  0x58   :  { %733 = vmatpush.bf16.msrb.mxu0 %v2296_v54 }
  0x5a   :  { %775 = vmatpush.bf16.msrb.mxu3 %v2294_v52  ;;  %747 = vmatpush.bf16.msrb.mxu1 %v2299_v58 }
  0x5b   :  { %761 = vmatpush.bf16.msrb.mxu2 %v2303_v63 }
  0x5c   :  { %734 = vmatpush.bf16.msrb.mxu0 %v2309_v13 }
  0x5e   :  { %776 = vmatpush.bf16.msrb.mxu3 %v2307_v5  ;;  %748 = vmatpush.bf16.msrb.mxu1 %v2311_v14 }
  0x5f   :  { %424 = vmatmul.bf16.gmra.mxu0 %v1761_v40  ;;  %762 = vmatpush.bf16.msrb.mxu2 %v2314_v19 }
  0x60   :  { %463 = vmatmul.bf16.gmra.mxu1 %v1761_v40  ;;  %824 = vmatpush.bf16.msra.mxu0 %v2223_v38 }
  0x61   :  { %502 = vmatmul.bf16.gmra.mxu2 %v1761_v40  ;;  %541 = vmatmul.bf16.gmra.mxu3 %v1761_v40 }
  0x62   :  { %838 = vmatpush.bf16.msra.mxu1 %v2227_v47  ;;  %866 = vmatpush.bf16.msra.mxu3 %v2225_v42 }
  0x63   :  { %852 = vmatpush.bf16.msra.mxu2 %v2230_v48 }
  0x64   :  { %825 = vmatpush.bf16.msra.mxu0 %v2232_v49 }
  0x66   :  { %839 = vmatpush.bf16.msra.mxu1 %v2238_v59  ;;  %867 = vmatpush.bf16.msra.mxu3 %v2235_v53 }
  0x67   :  { %853 = vmatpush.bf16.msra.mxu2 %v2242_v60 }
  0x68   :  { %826 = vmatpush.bf16.msra.mxu0 %v2244_v61 }
  0x6a   :  { %840 = vmatpush.bf16.msra.mxu1 %v2250_v7  ;;  %868 = vmatpush.bf16.msra.mxu3 %v2247_v1 }
  0x6b   :  { %854 = vmatpush.bf16.msra.mxu2 %v2254_v8 }
  0x6c   :  { %827 = vmatpush.bf16.msra.mxu0 %v2256_v9 }
  0x6e   :  { %841 = vmatpush.bf16.msra.mxu1 %v2262_v15  ;;  %869 = vmatpush.bf16.msra.mxu3 %v2259_v12 }
  0x6f   :  { %429 = vmatmul.bf16.gmra.mxu0 %v1762_v0  ;;  %855 = vmatpush.bf16.msra.mxu2 %v2266_v16 }
  0x70   :  { %468 = vmatmul.bf16.gmra.mxu1 %v1762_v0  ;;  %828 = vmatpush.bf16.msra.mxu0 %v2273_v25 }
  0x71   :  { %507 = vmatmul.bf16.gmra.mxu2 %v1762_v0  ;;  %546 = vmatmul.bf16.gmra.mxu3 %v1762_v0 }
  0x72   :  { %842 = vmatpush.bf16.msra.mxu1 %v2275_v26  ;;  %870 = vmatpush.bf16.msra.mxu3 %v2271_v21 }
  0x73   :  { %856 = vmatpush.bf16.msra.mxu2 %v2278_v30 }
  0x74   :  { %829 = vmatpush.bf16.msra.mxu0 %v2284_v35 }
  0x76   :  { %843 = vmatpush.bf16.msra.mxu1 %v2287_v39  ;;  %871 = vmatpush.bf16.msra.mxu3 %v2282_v34 }
  0x77   :  { %857 = vmatpush.bf16.msra.mxu2 %v2292_v45 }
  0x78   :  { %830 = vmatpush.bf16.msra.mxu0 %v2296_v54 }
  0x7a   :  { %844 = vmatpush.bf16.msra.mxu1 %v2299_v58  ;;  %872 = vmatpush.bf16.msra.mxu3 %v2294_v52 }
  0x7b   :  { %858 = vmatpush.bf16.msra.mxu2 %v2303_v63 }
  0x7c   :  { %831 = vmatpush.bf16.msra.mxu0 %v2309_v13 }
  0x7e   :  { %845 = vmatpush.bf16.msra.mxu1 %v2311_v14  ;;  %873 = vmatpush.bf16.msra.mxu3 %v2307_v5 }
  0x7f   :  { %434 = vmatmul.bf16.gmra.mxu0 %v1763_v20  ;;  %859 = vmatpush.bf16.msra.mxu2 %v2314_v19 }
  0x80   :  { %473 = vmatmul.bf16.gmra.mxu1 %v1763_v20 }
  0x81   :  { %512 = vmatmul.bf16.gmra.mxu2 %v1763_v20  ;;  %551 = vmatmul.bf16.gmra.mxu3 %v1763_v20 }
  0x8f   :  { %439 = vmatmul.bf16.gmra.mxu0 %v1764_v22 }
  0x90   :  { %478 = vmatmul.bf16.gmra.mxu1 %v1764_v22 }
  0x91   :  { %517 = vmatmul.bf16.gmra.mxu2 %v1764_v22  ;;  %556 = vmatmul.bf16.gmra.mxu3 %v1764_v22 }
  0x9f   :  { %735 = vmatmul.bf16.vlgmr.msrb.gmra.mxu0 %v566_v27 }
  0xa0   :  { %749 = vmatmul.bf16.vlgmr.msrb.gmra.mxu1 %v566_v27  ;;  %921 = vmatpush.bf16.msrb.mxu0 %v2223_v38 }
  0xa1   :  { %763 = vmatmul.bf16.vlgmr.msrb.gmra.mxu2 %v566_v27  ;;  %777 = vmatmul.bf16.vlgmr.msrb.gmra.mxu3 %v566_v27 }
  0xa2   :  { %935 = vmatpush.bf16.msrb.mxu1 %v2227_v47  ;;  %949 = vmatpush.bf16.msrb.mxu2 %v2230_v48 }
  0xa3   :  { %963 = vmatpush.bf16.msrb.mxu3 %v2225_v42 }
  0xa4   :  { %922 = vmatpush.bf16.msrb.mxu0 %v2232_v49 }
  0xa6   :  { %936 = vmatpush.bf16.msrb.mxu1 %v2238_v59  ;;  %950 = vmatpush.bf16.msrb.mxu2 %v2242_v60 }
  0xa7   :  { %964 = vmatpush.bf16.msrb.mxu3 %v2235_v53 }
  0xa8   :  { %923 = vmatpush.bf16.msrb.mxu0 %v2244_v61 }
  0xaa   :  { %937 = vmatpush.bf16.msrb.mxu1 %v2250_v7  ;;  %951 = vmatpush.bf16.msrb.mxu2 %v2254_v8 }
  0xab   :  { %965 = vmatpush.bf16.msrb.mxu3 %v2247_v1 }
  0xac   :  { %924 = vmatpush.bf16.msrb.mxu0 %v2256_v9 }
  0xae   :  { %938 = vmatpush.bf16.msrb.mxu1 %v2262_v15  ;;  %952 = vmatpush.bf16.msrb.mxu2 %v2266_v16 }
  0xaf   :  { %966 = vmatpush.bf16.msrb.mxu3 %v2259_v12 }
  0xb0   :  { %925 = vmatpush.bf16.msrb.mxu0 %v2273_v25 }
  0xb2   :  { %939 = vmatpush.bf16.msrb.mxu1 %v2275_v26  ;;  %953 = vmatpush.bf16.msrb.mxu2 %v2278_v30 }
  0xb3   :  { %967 = vmatpush.bf16.msrb.mxu3 %v2271_v21 }
  0xb4   :  { %926 = vmatpush.bf16.msrb.mxu0 %v2284_v35 }
  0xb6   :  { %940 = vmatpush.bf16.msrb.mxu1 %v2287_v39  ;;  %954 = vmatpush.bf16.msrb.mxu2 %v2292_v45 }
  0xb7   :  { %968 = vmatpush.bf16.msrb.mxu3 %v2282_v34 }
  0xb8   :  { %927 = vmatpush.bf16.msrb.mxu0 %v2296_v54 }
  0xba   :  { %941 = vmatpush.bf16.msrb.mxu1 %v2299_v58  ;;  %955 = vmatpush.bf16.msrb.mxu2 %v2303_v63 }
  0xbb   :  { %969 = vmatpush.bf16.msrb.mxu3 %v2294_v52 }
  0xbc   :  { %v415_v28 = vpop.f32.mrf.mxu0  ;;  %928 = vmatpush.bf16.msrb.mxu0 %v2309_v13 }
  0xbd   :  { %v454_v29 = vpop.f32.mrf.mxu1 }
  0xbe   :  { %942 = vmatpush.bf16.msrb.mxu1 %v2311_v14  ;;  %956 = vmatpush.bf16.msrb.mxu2 %v2314_v19 }
  0xbf   :  { %970 = vmatpush.bf16.msrb.mxu3 %v2307_v5 }
  0xc4   :  { %v2383_v31 = vpop.f32.mrf.mxu2  ;;  %v532_v32 = vpop.f32.mrf.mxu3 }
  0xc5   :  { %v417_v33 = vpop.f32.mrf.mxu0  ;;  %v456_v36 = vpop.f32.mrf.mxu1 }
  0xcc   :  { %v2385_v37 = vpop.f32.mrf.mxu2  ;;  %v2387_v40 = vpop.f32.mrf.mxu3 }
  0xcd   :  { %v2389_v41 = vpop.f32.mrf.mxu0  ;;  %v2391_v43 = vpop.f32.mrf.mxu1 }
  0xd4   :  { %v2393_v44 = vpop.f32.mrf.mxu2  ;;  %v2395_v46 = vpop.f32.mrf.mxu3 }
  0xd5   :  { %2725 = vst [vmem:[#allocation19_spill] sm:$0xff] %v2393_v44  ;;  %v2397_v50 = vpop.f32.mrf.mxu0  ;;  %v2399_v51 = vpop.f32.mrf.mxu1 }
  0xdc   :  { %v2401_v55 = vpop.f32.mrf.mxu2  ;;  %v2403_v56 = vpop.f32.mrf.mxu3 }
  0xdd   :  { %2726 = vst [vmem:[#allocation20_spill] sm:$0xff] %v2401_v55  ;;  %v2405_v57 = vpop.f32.mrf.mxu0  ;;  %v2407_v62 = vpop.f32.mrf.mxu1 }
  0xde   :  { %2727 = vst [vmem:[#allocation21_spill] sm:$0xff] %v2403_v56 }
  0xdf   :  { %2728 = vst [vmem:[#allocation22_spill] sm:$0xff] %v2405_v57 }
  0xe0   :  { %2729 = vst [vmem:[#allocation23_spill] sm:$0xff] %v2407_v62 }
  0xe4   :  { %v2409_v0 = vpop.f32.mrf.mxu2  ;;  %v2411_v2 = vpop.f32.mrf.mxu3 }
  0xe5   :  { %2730 = vst [vmem:[#allocation24_spill] sm:$0xff] %v2409_v0  ;;  %v2413_v3 = vpop.f32.mrf.mxu0  ;;  %v2415_v4 = vpop.f32.mrf.mxu1 }
  0xe6   :  { %2731 = vst [vmem:[#allocation25_spill] sm:$0xff] %v2411_v2 }
  0xe7   :  { %2732 = vst [vmem:[#allocation26_spill] sm:$0xff] %v2413_v3 }
  0xe8   :  { %2733 = vst [vmem:[#allocation27_spill] sm:$0xff] %v2415_v4 }
  0xec   :  { %v2417_v6 = vpop.f32.mrf.mxu2  ;;  %v2419_v10 = vpop.f32.mrf.mxu3 }
  0xed   :  { %2734 = vst [vmem:[#allocation28_spill] sm:$0xff] %v2417_v6  ;;  %v2421_v11 = vpop.f32.mrf.mxu0  ;;  %v2423_v17 = vpop.f32.mrf.mxu1 }
  0xee   :  { %2735 = vst [vmem:[#allocation29_spill] sm:$0xff] %v2419_v10 }
  0xef   :  { %2736 = vst [vmem:[#allocation30_spill] sm:$0xff] %v2421_v11 }
  0xf0   :  { %2737 = vst [vmem:[#allocation31_spill] sm:$0xff] %v2423_v17 }
  0xf4   :  { %v2425_v18 = vpop.f32.mrf.mxu2  ;;  %v2427_v20 = vpop.f32.mrf.mxu3 }
  0xf5   :  { %2738 = vst [vmem:[#allocation32_spill] sm:$0xff] %v2425_v18  ;;  %v2429_v22 = vpop.f32.mrf.mxu0  ;;  %v2431_v23 = vpop.f32.mrf.mxu1 }
  0xf6   :  { %2739 = vst [vmem:[#allocation33_spill] sm:$0xff] %v2427_v20 }
  0xf7   :  { %2740 = vst [vmem:[#allocation34_spill] sm:$0xff] %v2429_v22 }
  0xf8   :  { %2741 = vst [vmem:[#allocation35_spill] sm:$0xff] %v2431_v23 }
  0xfc   :  { %v2433_v24 = vpop.f32.mrf.mxu2  ;;  %v2435_v27 = vpop.f32.mrf.mxu3 }
  0xfd   :  { %2742 = vst [vmem:[#allocation36_spill] sm:$0xff] %v2433_v24  ;;  %v2437_v0 = vpop.f32.mrf.mxu0  ;;  %v2439_v6 = vpop.f32.mrf.mxu1 }
  0xfe   :  { %2743 = vst [vmem:[#allocation37_spill] sm:$0xff] %v2435_v27 }
  0xff   :  { %2744 = vst [vmem:[#allocation38_spill] sm:$0xff] %v2437_v0 }
 0x100   :  { %2745 = vst [vmem:[#allocation39_spill] sm:$0xff] %v2439_v6 }
 0x104   :  { %v2441_v10 = vpop.f32.mrf.mxu2  ;;  %v2443_v11 = vpop.f32.mrf.mxu3 }
 0x105   :  { %2746 = vst [vmem:[#allocation40_spill] sm:$0xff] %v2441_v10  ;;  %v2445_v17 = vpop.f32.mrf.mxu0  ;;  %v2447_v18 = vpop.f32.mrf.mxu1  ;;  %v200_v10 = vld [vmem:[%s2721_s5] sm:$0xf] }
 0x106   :  { %2747 = vst [vmem:[#allocation41_spill] sm:$0xff] %v2443_v11  ;;  %v2478_v2 = vperm.slane %v200_v10, 3 }
 0x107   :  { %2748 = vst [vmem:[#allocation42_spill] sm:$0xff] %v2445_v17 }
 0x108   :  { %2749 = vst [vmem:[#allocation43_spill] sm:$0xff] %v2447_v18  ;;  %v2468_v18 = vperm.slane %v200_v10, 0 }
 0x10c   :  { %v2449_v20 = vpop.f32.mrf.mxu2  ;;  %v2451_v22 = vpop.f32.mrf.mxu3 }
 0x10d   :  { %2750 = vst [vmem:[#allocation44_spill] sm:$0xff] %v2449_v20  ;;  %v2453_v23 = vpop.f32.mrf.mxu0  ;;  %v2455_v24 = vpop.f32.mrf.mxu1  ;;  %v2470_v20 = vperm.slane %v200_v10, 1 }
 0x10e   :  { %2751 = vst [vmem:[#allocation45_spill] sm:$0xff] %v2451_v22 }
 0x10f   :  { %2752 = vst [vmem:[#allocation46_spill] sm:$0xff] %v2453_v23  ;;  %v416_v23 = vadd.f32 %v415_v28, %v2468_v18  ;;  %v2482_v28 = vperm.slane %v200_v10, 2  ;;  %v564_v10 = vld [vmem:[#allocation7] sm:$0xff] }
 0x110   :  { %2753 = vst [vmem:[#allocation47_spill] sm:$0xff] %v2455_v24 }
 0x114   :  { %v2457_v27 = vpop.f32.mrf.mxu2  ;;  %v2462_v6 = vpop.f32.mrf.mxu3 }
 0x115   :  { %2754 = vst [vmem:[#allocation48_spill] sm:$0xff] %v2457_v27  ;;  %v2464_v11 = vpop.f32.mrf.mxu0  ;;  %v2466_v17 = vpop.f32.mrf.mxu1  ;;  %v455_v27 = vadd.f32 %v454_v29, %v2470_v20 }
 0x116   :  { %2755 = vst [vmem:[#allocation49_spill] sm:$0xff] %v2462_v6 }
 0x117   :  { %2756 = vst [vmem:[#allocation50_spill] sm:$0xff] %v2464_v11  ;;  %v418_v11 = vadd.f32 %v417_v33, %v2468_v18 }
 0x118   :  { %2757 = vst [vmem:[#allocation51_spill] sm:$0xff] %v2466_v17  ;;  %v533_v17 = vadd.f32 %v532_v32, %v2478_v2  ;;  %v494_v32 = vadd.f32 %v2383_v31, %v2482_v28 }
 0x11c   :  { %v2473_v22 = vpop.f32.mrf.mxu2  ;;  %v2476_v24 = vpop.f32.mrf.mxu3 }
 0x11d   :  { %2758 = vst [vmem:[#allocation52_spill] sm:$0xff] %v2473_v22  ;;  %v736_v0 = vpop.f32.mrf.mxu0  ;;  %v750_v3 = vpop.f32.mrf.mxu1  ;;  %v457_v22 = vadd.f32 %v456_v36, %v2470_v20  ;;  %v535_v36 = vadd.f32 %v2387_v40, %v2478_v2 }
 0x11e   :  { %2759 = vst [vmem:[#allocation53_spill] sm:$0xff] %v2476_v24  ;;  %v783_v4 = vadd.f32 %v736_v0, %v416_v23  ;;  %v784_v6 = vadd.f32 %v750_v3, %v455_v27 }
 0x120   :  { %1819 = vtanh.f32 %v783_v4 }
 0x121   :  { %1821 = vtanh.f32 %v784_v6 }
 0x124   :  { %v764_v62 = vpop.f32.mrf.mxu2  ;;  %v778_v29 = vpop.f32.mrf.mxu3 }
 0x125   :  { %v738_v57 = vpop.f32.mrf.mxu0  ;;  %v786_v55 = vadd.f32 %v778_v29, %v533_v17  ;;  %v752_v23 = vpop.f32.mrf.mxu1  ;;  %v785_v6 = vadd.f32 %v764_v62, %v494_v32 }
 0x126   :  { %v1820_v24 = vpop.eup %1819  ;;  %v787_v0 = vadd.f32 %v738_v57, %v418_v11  ;;  %v788_v27 = vadd.f32 %v752_v23, %v457_v22  ;;  %v496_v57 = vadd.f32 %v2385_v37, %v2482_v28 }
 0x127   :  { %v1822_v3 = vpop.eup %1821  ;;  %1823 = vtanh.f32 %v786_v55  ;;  %v799_v4 = vmul.f32 0.5, %v1820_v24 }
 0x128   :  { %v800_v56 = vmul.f32 0.5, %v1822_v3  ;;  %1825 = vtanh.f32 %v787_v0 }
 0x129   :  { %1827 = vtanh.f32 %v788_v27  ;;  %v805_v11 = vadd.f32 0.5, %v799_v4  ;;  %v565_v27 = vld [vmem:[#allocation7 + $0x8] sm:$0xff] }
 0x12a   :  { %v806_v33 = vadd.f32 0.5, %v800_v56  ;;  %1829 = vtanh.f32 %v785_v6 }
 0x12c   :  { %v766_v44 = vpop.f32.mrf.mxu2  ;;  %v780_v17 = vpop.f32.mrf.mxu3  ;;  %v811_v23 = vmul.f32 %v806_v33, %v564_v10 }
 0x12d   :  { %v1824_v22 = vpop.eup %1823  ;;  %v790_v55 = vadd.f32 %v780_v17, %v535_v36  ;;  %v789_v24 = vadd.f32 %v766_v44, %v496_v57 }
 0x12e   :  { %v1826_v29 = vpop.eup %1825  ;;  %v813_v31 = vmul.f32 %v1824_v22, %v805_v11 }
 0x12f   :  { %v1828_v0 = vpop.eup %1827  ;;  %1831 = vtanh.f32 %v790_v55  ;;  %v802_v62 = vmul.f32 0.5, %v1826_v29 }
 0x130   :  { %v2491_v56 = vadd.f32 %v813_v31, %v811_v23  ;;  %v803_v40 = vmul.f32 0.5, %v1828_v0  ;;  %1833 = vtanh.f32 %v789_v24  ;;  %v1830_v32 = vpop.eup %1829 }
 0x131   :  { %v808_v37 = vadd.f32 0.5, %v802_v62  ;;  %v801_v6 = vmul.f32 0.5, %v1830_v32  ;;  %v421_v62 = vadd.f32 %v2389_v41, %v2468_v18 }
 0x132   :  { %v809_v3 = vadd.f32 0.5, %v803_v40  ;;  %1835 = vtanh.f32 %v2491_v56  ;;  %v460_v40 = vadd.f32 %v2391_v43, %v2470_v20 }
 0x133   :  { %v807_v11 = vadd.f32 0.5, %v801_v6 }
 0x134   :  { %v812_v36 = vmul.f32 %v809_v3, %v565_v27 }
 0x135   :  { %v1832_v4 = vpop.eup %1831 }
 0x136   :  { %v814_v17 = vmul.f32 %v1832_v4, %v808_v37  ;;  %v1834_v33 = vpop.eup %1833  ;;  %v538_v4 = vadd.f32 %v2395_v46, %v2478_v2 }
 0x137   :  { %v804_v57 = vmul.f32 0.5, %v1834_v33 }
 0x138   :  { %v2494_v10 = vadd.f32 %v814_v17, %v812_v36  ;;  %v1836_v44 = vpop.eup %1835  ;;  %v423_v36 = vadd.f32 %v2397_v50, %v2468_v18  ;;  %v462_v17 = vadd.f32 %v2399_v51, %v2470_v20  ;;  %v2761_v50 = vld [vmem:[#allocation21_spill] sm:$0xff] }
 0x139   :  { %v819_v22 = vmul.f32 %v1836_v44, %v807_v11  ;;  %v810_v55 = vadd.f32 0.5, %v804_v57  ;;  %v540_v51 = vadd.f32 %v2761_v50, %v2478_v2 }
 0x13a   :  { %1837 = vtanh.f32 %v2494_v10 }
 0x13b   :  { %1839 = vtanh.f32 %v819_v22 }
 0x140   :  { %v1838_v29 = vpop.eup %1837 }
 0x141   :  { %v820_v23 = vmul.f32 %v1838_v29, %v810_v55  ;;  %v1840_v31 = vpop.eup %1839 }
 0x143   :  { %1841 = vtanh.f32 %v820_v23  ;;  %v2760_v23 = vld [vmem:[#allocation19_spill] sm:$0xff] }
 0x144   :  { %v499_v46 = vadd.f32 %v2760_v23, %v2482_v28 }
 0x149   :  { %v1842_v24 = vpop.eup %1841 }
 0x14a   :  { %v823_v0 = vpack.c.bf16 %v1842_v24, %v1840_v31 }
 0x14c   :  { %832 = vmatmul.bf16.vlgmr.msra.gmra.mxu0 %v823_v0  ;;  %846 = vmatmul.bf16.vlgmr.msra.gmra.mxu1 %v823_v0 }
 0x14d   :  { %860 = vmatmul.bf16.vlgmr.msra.gmra.mxu2 %v823_v0  ;;  %874 = vmatmul.bf16.vlgmr.msra.gmra.mxu3 %v823_v0 }
 0x14e   :  { %1018 = vmatpush.bf16.msra.mxu0 %v2223_v38  ;;  %1032 = vmatpush.bf16.msra.mxu1 %v2227_v47 }
 0x14f   :  { %1046 = vmatpush.bf16.msra.mxu2 %v2230_v48  ;;  %1060 = vmatpush.bf16.msra.mxu3 %v2225_v42 }
 0x152   :  { %1019 = vmatpush.bf16.msra.mxu0 %v2232_v49  ;;  %1033 = vmatpush.bf16.msra.mxu1 %v2238_v59 }
 0x153   :  { %1047 = vmatpush.bf16.msra.mxu2 %v2242_v60  ;;  %1061 = vmatpush.bf16.msra.mxu3 %v2235_v53 }
 0x156   :  { %1020 = vmatpush.bf16.msra.mxu0 %v2244_v61  ;;  %1034 = vmatpush.bf16.msra.mxu1 %v2250_v7 }
 0x157   :  { %1048 = vmatpush.bf16.msra.mxu2 %v2254_v8  ;;  %1062 = vmatpush.bf16.msra.mxu3 %v2247_v1 }
 0x15a   :  { %1021 = vmatpush.bf16.msra.mxu0 %v2256_v9  ;;  %1035 = vmatpush.bf16.msra.mxu1 %v2262_v15 }
 0x15b   :  { %1049 = vmatpush.bf16.msra.mxu2 %v2266_v16  ;;  %1063 = vmatpush.bf16.msra.mxu3 %v2259_v12 }
 0x15e   :  { %1022 = vmatpush.bf16.msra.mxu0 %v2273_v25  ;;  %1036 = vmatpush.bf16.msra.mxu1 %v2275_v26 }
 0x15f   :  { %1050 = vmatpush.bf16.msra.mxu2 %v2278_v30  ;;  %1064 = vmatpush.bf16.msra.mxu3 %v2271_v21 }
 0x162   :  { %1023 = vmatpush.bf16.msra.mxu0 %v2284_v35  ;;  %1037 = vmatpush.bf16.msra.mxu1 %v2287_v39 }
 0x163   :  { %1051 = vmatpush.bf16.msra.mxu2 %v2292_v45  ;;  %1065 = vmatpush.bf16.msra.mxu3 %v2282_v34 }
 0x166   :  { %1024 = vmatpush.bf16.msra.mxu0 %v2296_v54  ;;  %1038 = vmatpush.bf16.msra.mxu1 %v2299_v58 }
 0x167   :  { %1052 = vmatpush.bf16.msra.mxu2 %v2303_v63  ;;  %1066 = vmatpush.bf16.msra.mxu3 %v2294_v52 }
 0x16a   :  { %1025 = vmatpush.bf16.msra.mxu0 %v2309_v13  ;;  %1039 = vmatpush.bf16.msra.mxu1 %v2311_v14 }
 0x16b   :  { %1053 = vmatpush.bf16.msra.mxu2 %v2314_v19  ;;  %1067 = vmatpush.bf16.msra.mxu3 %v2307_v5 }
 0x1c9   :  { %v833_v3 = vpop.f32.mrf.mxu0  ;;  %v847_v27 = vpop.f32.mrf.mxu1 }
 0x1ca   :  { %v880_v32 = vadd.f32 %v833_v3, %v421_v62  ;;  %v881_v37 = vadd.f32 %v847_v27, %v460_v40  ;;  %v2762_v3 = vld [vmem:[#allocation20_spill] sm:$0xff] }
 0x1cb   :  { %v501_v27 = vadd.f32 %v2762_v3, %v2482_v28 }
 0x1cc   :  { %1843 = vtanh.f32 %v880_v32 }
 0x1cd   :  { %1845 = vtanh.f32 %v881_v37 }
 0x1d0   :  { %v861_v33 = vpop.f32.mrf.mxu2  ;;  %v875_v41 = vpop.f32.mrf.mxu3 }
 0x1d1   :  { %v883_v6 = vadd.f32 %v875_v41, %v538_v4  ;;  %v835_v44 = vpop.f32.mrf.mxu0  ;;  %v849_v43 = vpop.f32.mrf.mxu1  ;;  %v882_v0 = vadd.f32 %v861_v33, %v499_v46 }
 0x1d2   :  { %v1844_v57 = vpop.eup %1843  ;;  %v884_v11 = vadd.f32 %v835_v44, %v423_v36  ;;  %v885_v22 = vadd.f32 %v849_v43, %v462_v17 }
 0x1d3   :  { %v1846_v55 = vpop.eup %1845  ;;  %1847 = vtanh.f32 %v883_v6  ;;  %v896_v31 = vmul.f32 0.5, %v1844_v57 }
 0x1d4   :  { %v897_v29 = vmul.f32 0.5, %v1846_v55  ;;  %1849 = vtanh.f32 %v884_v11 }
 0x1d5   :  { %1851 = vtanh.f32 %v885_v22  ;;  %v902_v32 = vadd.f32 0.5, %v896_v31 }
 0x1d6   :  { %v903_v24 = vadd.f32 0.5, %v897_v29  ;;  %1853 = vtanh.f32 %v882_v0 }
 0x1d8   :  { %v863_v62 = vpop.f32.mrf.mxu2  ;;  %v877_v40 = vpop.f32.mrf.mxu3  ;;  %v908_v17 = vmul.f32 %v903_v24, %v2491_v56 }
 0x1d9   :  { %v887_v37 = vadd.f32 %v877_v40, %v540_v51  ;;  %v1848_v4 = vpop.eup %1847  ;;  %v886_v6 = vadd.f32 %v863_v62, %v501_v27 }
 0x1da   :  { %v1850_v36 = vpop.eup %1849  ;;  %v910_v41 = vmul.f32 %v1848_v4, %v902_v32 }
 0x1db   :  { %v1852_v44 = vpop.eup %1851  ;;  %1855 = vtanh.f32 %v887_v37  ;;  %v899_v57 = vmul.f32 0.5, %v1850_v36 }
 0x1dc   :  { %v2546_v43 = vadd.f32 %v910_v41, %v908_v17  ;;  %v900_v33 = vmul.f32 0.5, %v1852_v44  ;;  %1857 = vtanh.f32 %v886_v6  ;;  %v1854_v22 = vpop.eup %1853  ;;  %v2764_v17 = vld [vmem:[#allocation23_spill] sm:$0xff] }
 0x1dd   :  { %v905_v55 = vadd.f32 0.5, %v899_v57  ;;  %v898_v31 = vmul.f32 0.5, %v1854_v22  ;;  %v465_v41 = vadd.f32 %v2764_v17, %v2470_v20 }
 0x1de   :  { %v906_v11 = vadd.f32 0.5, %v900_v33  ;;  %1859 = vtanh.f32 %v2546_v43 }
 0x1df   :  { %v904_v0 = vadd.f32 0.5, %v898_v31 }
 0x1e0   :  { %v909_v23 = vmul.f32 %v906_v11, %v2494_v10  ;;  %v2763_v10 = vld [vmem:[#allocation22_spill] sm:$0xff]  ;;  %v2765_v11 = vld [vmem:[#allocation25_spill] sm:$0xff] }
 0x1e1   :  { %v1856_v29 = vpop.eup %1855  ;;  %v426_v36 = vadd.f32 %v2763_v10, %v2468_v18  ;;  %v543_v22 = vadd.f32 %v2765_v11, %v2478_v2 }
 0x1e2   :  { %v911_v46 = vmul.f32 %v1856_v29, %v905_v55  ;;  %v1858_v56 = vpop.eup %1857  ;;  %v2766_v55 = vld [vmem:[#allocation26_spill] sm:$0xff] }
 0x1e3   :  { %v901_v24 = vmul.f32 0.5, %v1858_v56  ;;  %v428_v29 = vadd.f32 %v2766_v55, %v2468_v18 }
 0x1e4   :  { %v2550_v50 = vadd.f32 %v911_v46, %v909_v23  ;;  %v1860_v51 = vpop.eup %1859  ;;  %v2767_v23 = vld [vmem:[#allocation27_spill] sm:$0xff] }
 0x1e5   :  { %v916_v62 = vmul.f32 %v1860_v51, %v904_v0  ;;  %v907_v40 = vadd.f32 0.5, %v901_v24  ;;  %v467_v46 = vadd.f32 %v2767_v23, %v2470_v20 }
 0x1e6   :  { %1861 = vtanh.f32 %v2550_v50 }
 0x1e7   :  { %1863 = vtanh.f32 %v916_v62 }
 0x1ec   :  { %v1862_v3 = vpop.eup %1861 }
 0x1ed   :  { %v917_v27 = vmul.f32 %v1862_v3, %v907_v40  ;;  %v1864_v32 = vpop.eup %1863 }
 0x1ef   :  { %1865 = vtanh.f32 %v917_v27 }
 0x1f5   :  { %v1866_v37 = vpop.eup %1865 }
 0x1f6   :  { %v920_v4 = vpack.c.bf16 %v1866_v37, %v1864_v32  ;;  %v2768_v37 = vld [vmem:[#allocation24_spill] sm:$0xff] }
 0x1f8   :  { %929 = vmatmul.bf16.vlgmr.msrb.gmra.mxu0 %v920_v4  ;;  %943 = vmatmul.bf16.vlgmr.msrb.gmra.mxu1 %v920_v4 }
 0x1f9   :  { %957 = vmatmul.bf16.vlgmr.msrb.gmra.mxu2 %v920_v4  ;;  %971 = vmatmul.bf16.vlgmr.msrb.gmra.mxu3 %v920_v4  ;;  %v504_v4 = vadd.f32 %v2768_v37, %v2482_v28 }
 0x1fa   :  { %1115 = vmatpush.bf16.msrb.mxu0 %v2223_v38  ;;  %1129 = vmatpush.bf16.msrb.mxu1 %v2227_v47 }
 0x1fb   :  { %1143 = vmatpush.bf16.msrb.mxu2 %v2230_v48  ;;  %1157 = vmatpush.bf16.msrb.mxu3 %v2225_v42 }
 0x1fe   :  { %1116 = vmatpush.bf16.msrb.mxu0 %v2232_v49  ;;  %1130 = vmatpush.bf16.msrb.mxu1 %v2238_v59 }
 0x1ff   :  { %1144 = vmatpush.bf16.msrb.mxu2 %v2242_v60  ;;  %1158 = vmatpush.bf16.msrb.mxu3 %v2235_v53 }
 0x202   :  { %1117 = vmatpush.bf16.msrb.mxu0 %v2244_v61  ;;  %1131 = vmatpush.bf16.msrb.mxu1 %v2250_v7 }
 0x203   :  { %1145 = vmatpush.bf16.msrb.mxu2 %v2254_v8  ;;  %1159 = vmatpush.bf16.msrb.mxu3 %v2247_v1 }
 0x206   :  { %1118 = vmatpush.bf16.msrb.mxu0 %v2256_v9  ;;  %1132 = vmatpush.bf16.msrb.mxu1 %v2262_v15 }
 0x207   :  { %1146 = vmatpush.bf16.msrb.mxu2 %v2266_v16  ;;  %1160 = vmatpush.bf16.msrb.mxu3 %v2259_v12 }
 0x20a   :  { %1119 = vmatpush.bf16.msrb.mxu0 %v2273_v25  ;;  %1133 = vmatpush.bf16.msrb.mxu1 %v2275_v26 }
 0x20b   :  { %1147 = vmatpush.bf16.msrb.mxu2 %v2278_v30  ;;  %1161 = vmatpush.bf16.msrb.mxu3 %v2271_v21 }
 0x20e   :  { %1120 = vmatpush.bf16.msrb.mxu0 %v2284_v35  ;;  %1134 = vmatpush.bf16.msrb.mxu1 %v2287_v39 }
 0x20f   :  { %1148 = vmatpush.bf16.msrb.mxu2 %v2292_v45  ;;  %1162 = vmatpush.bf16.msrb.mxu3 %v2282_v34 }
 0x212   :  { %1121 = vmatpush.bf16.msrb.mxu0 %v2296_v54  ;;  %1135 = vmatpush.bf16.msrb.mxu1 %v2299_v58 }
 0x213   :  { %1149 = vmatpush.bf16.msrb.mxu2 %v2303_v63  ;;  %1163 = vmatpush.bf16.msrb.mxu3 %v2294_v52 }
 0x216   :  { %1122 = vmatpush.bf16.msrb.mxu0 %v2309_v13  ;;  %1136 = vmatpush.bf16.msrb.mxu1 %v2311_v14 }
 0x217   :  { %1150 = vmatpush.bf16.msrb.mxu2 %v2314_v19  ;;  %1164 = vmatpush.bf16.msrb.mxu3 %v2307_v5 }
 0x275   :  { %v930_v6 = vpop.f32.mrf.mxu0  ;;  %v944_v44 = vpop.f32.mrf.mxu1 }
 0x276   :  { %v977_v57 = vadd.f32 %v930_v6, %v426_v36  ;;  %v978_v33 = vadd.f32 %v944_v44, %v465_v41  ;;  %v2769_v36 = vld [vmem:[#allocation29_spill] sm:$0xff] }
 0x277   :  { %v545_v17 = vadd.f32 %v2769_v36, %v2478_v2 }
 0x278   :  { %1867 = vtanh.f32 %v977_v57 }
 0x279   :  { %1869 = vtanh.f32 %v978_v33  ;;  %v2770_v33 = vld [vmem:[#allocation28_spill] sm:$0xff] }
 0x27a   :  { %v506_v11 = vadd.f32 %v2770_v33, %v2482_v28 }
 0x27c   :  { %v958_v56 = vpop.f32.mrf.mxu2  ;;  %v972_v31 = vpop.f32.mrf.mxu3 }
 0x27d   :  { %v980_v51 = vadd.f32 %v972_v31, %v543_v22  ;;  %v932_v24 = vpop.f32.mrf.mxu0  ;;  %v946_v0 = vpop.f32.mrf.mxu1  ;;  %v979_v6 = vadd.f32 %v958_v56, %v504_v4 }
 0x27e   :  { %v1868_v62 = vpop.eup %1867  ;;  %v981_v40 = vadd.f32 %v932_v24, %v428_v29  ;;  %v982_v3 = vadd.f32 %v946_v0, %v467_v46 }
 0x27f   :  { %v1870_v27 = vpop.eup %1869  ;;  %1871 = vtanh.f32 %v980_v51  ;;  %v993_v10 = vmul.f32 0.5, %v1868_v62 }
 0x280   :  { %v994_v32 = vmul.f32 0.5, %v1870_v27  ;;  %1873 = vtanh.f32 %v981_v40 }
 0x281   :  { %1875 = vtanh.f32 %v982_v3  ;;  %v999_v22 = vadd.f32 0.5, %v993_v10 }
 0x282   :  { %v1000_v41 = vadd.f32 0.5, %v994_v32  ;;  %1877 = vtanh.f32 %v979_v6 }
 0x284   :  { %v960_v44 = vpop.f32.mrf.mxu2  ;;  %v974_v57 = vpop.f32.mrf.mxu3  ;;  %v1005_v46 = vmul.f32 %v1000_v41, %v2546_v43 }
 0x285   :  { %v984_v55 = vadd.f32 %v974_v57, %v545_v17  ;;  %v1872_v29 = vpop.eup %1871  ;;  %v983_v51 = vadd.f32 %v960_v44, %v506_v11 }
 0x286   :  { %v1874_v23 = vpop.eup %1873  ;;  %v1007_v31 = vmul.f32 %v1872_v29, %v999_v22 }
 0x287   :  { %v1876_v24 = vpop.eup %1875  ;;  %1879 = vtanh.f32 %v984_v55  ;;  %v996_v62 = vmul.f32 0.5, %v1874_v23  ;;  %v2778_v23 = vld [vmem:[#allocation36_spill] sm:$0xff] }
 0x288   :  { %v2602_v0 = vadd.f32 %v1007_v31, %v1005_v46  ;;  %v997_v56 = vmul.f32 0.5, %v1876_v24  ;;  %1881 = vtanh.f32 %v983_v51  ;;  %v1878_v3 = vpop.eup %1877  ;;  %v511_v46 = vadd.f32 %v2778_v23, %v2482_v28 }
 0x289   :  { %v1002_v27 = vadd.f32 0.5, %v996_v62  ;;  %v995_v10 = vmul.f32 0.5, %v1878_v3 }
 0x28a   :  { %v1003_v40 = vadd.f32 0.5, %v997_v56  ;;  %1883 = vtanh.f32 %v2602_v0 }
 0x28b   :  { %v1001_v6 = vadd.f32 0.5, %v995_v10 }
 0x28c   :  { %v1006_v37 = vmul.f32 %v1003_v40, %v2550_v50 }
 0x28d   :  { %v1880_v32 = vpop.eup %1879 }
 0x28e   :  { %v1008_v4 = vmul.f32 %v1880_v32, %v1002_v27  ;;  %v1882_v43 = vpop.eup %1881 }
 0x28f   :  { %v998_v41 = vmul.f32 0.5, %v1882_v43 }
 0x290   :  { %v2606_v36 = vadd.f32 %v1008_v4, %v1006_v37  ;;  %v1884_v17 = vpop.eup %1883 }
 0x291   :  { %v1013_v44 = vmul.f32 %v1884_v17, %v1001_v6  ;;  %v1004_v57 = vadd.f32 0.5, %v998_v41 }
 0x292   :  { %1885 = vtanh.f32 %v2606_v36 }
 0x293   :  { %1887 = vtanh.f32 %v1013_v44 }
 0x298   :  { %v1886_v33 = vpop.eup %1885 }
 0x299   :  { %v1014_v11 = vmul.f32 %v1886_v33, %v1004_v57  ;;  %v1888_v22 = vpop.eup %1887 }
 0x29b   :  { %1889 = vtanh.f32 %v1014_v11 }
 0x2a1   :  { %v1890_v55 = vpop.eup %1889 }
 0x2a2   :  { %v1017_v29 = vpack.c.bf16 %v1890_v55, %v1888_v22 }
 0x2a4   :  { %1026 = vmatmul.bf16.vlgmr.msra.gmra.mxu0 %v1017_v29  ;;  %1040 = vmatmul.bf16.vlgmr.msra.gmra.mxu1 %v1017_v29 }
 0x2a5   :  { %1054 = vmatmul.bf16.vlgmr.msra.gmra.mxu2 %v1017_v29  ;;  %1068 = vmatmul.bf16.vlgmr.msra.gmra.mxu3 %v1017_v29 }
 0x2a6   :  { %1212 = vmatpush.bf16.msra.mxu0 %v2223_v38  ;;  %1226 = vmatpush.bf16.msra.mxu1 %v2227_v47  ;;  %v2771_v38 = vld [vmem:[#allocation30_spill] sm:$0xff]  ;;  %v2772_v47 = vld [vmem:[#allocation31_spill] sm:$0xff] }
 0x2a7   :  { %1240 = vmatpush.bf16.msra.mxu2 %v2230_v48  ;;  %1254 = vmatpush.bf16.msra.mxu3 %v2225_v42  ;;  %v431_v42 = vadd.f32 %v2771_v38, %v2468_v18  ;;  %v470_v48 = vadd.f32 %v2772_v47, %v2470_v20 }
 0x2aa   :  { %1213 = vmatpush.bf16.msra.mxu0 %v2232_v49  ;;  %1227 = vmatpush.bf16.msra.mxu1 %v2238_v59 }
 0x2ab   :  { %1241 = vmatpush.bf16.msra.mxu2 %v2242_v60  ;;  %1255 = vmatpush.bf16.msra.mxu3 %v2235_v53 }
 0x2ae   :  { %1214 = vmatpush.bf16.msra.mxu0 %v2244_v61  ;;  %1228 = vmatpush.bf16.msra.mxu1 %v2250_v7  ;;  %v2773_v61 = vld [vmem:[#allocation33_spill] sm:$0xff]  ;;  %v2774_v7 = vld [vmem:[#allocation34_spill] sm:$0xff] }
 0x2af   :  { %1242 = vmatpush.bf16.msra.mxu2 %v2254_v8  ;;  %1256 = vmatpush.bf16.msra.mxu3 %v2247_v1  ;;  %v548_v1 = vadd.f32 %v2773_v61, %v2478_v2  ;;  %v433_v8 = vadd.f32 %v2774_v7, %v2468_v18 }
 0x2b2   :  { %1215 = vmatpush.bf16.msra.mxu0 %v2256_v9  ;;  %1229 = vmatpush.bf16.msra.mxu1 %v2262_v15  ;;  %v2775_v9 = vld [vmem:[#allocation35_spill] sm:$0xff] }
 0x2b3   :  { %1243 = vmatpush.bf16.msra.mxu2 %v2266_v16  ;;  %1257 = vmatpush.bf16.msra.mxu3 %v2259_v12  ;;  %v472_v12 = vadd.f32 %v2775_v9, %v2470_v20 }
 0x2b6   :  { %1216 = vmatpush.bf16.msra.mxu0 %v2273_v25  ;;  %1230 = vmatpush.bf16.msra.mxu1 %v2275_v26 }
 0x2b7   :  { %1244 = vmatpush.bf16.msra.mxu2 %v2278_v30  ;;  %1258 = vmatpush.bf16.msra.mxu3 %v2271_v21 }
 0x2ba   :  { %1217 = vmatpush.bf16.msra.mxu0 %v2284_v35  ;;  %1231 = vmatpush.bf16.msra.mxu1 %v2287_v39 }
 0x2bb   :  { %1245 = vmatpush.bf16.msra.mxu2 %v2292_v45  ;;  %1259 = vmatpush.bf16.msra.mxu3 %v2282_v34 }
 0x2be   :  { %1218 = vmatpush.bf16.msra.mxu0 %v2296_v54  ;;  %1232 = vmatpush.bf16.msra.mxu1 %v2299_v58 }
 0x2bf   :  { %1246 = vmatpush.bf16.msra.mxu2 %v2303_v63  ;;  %1260 = vmatpush.bf16.msra.mxu3 %v2294_v52  ;;  %v2776_v52 = vld [vmem:[#allocation32_spill] sm:$0xff]  ;;  %v2777_v63 = vld [vmem:[#allocation37_spill] sm:$0xff] }
 0x2c0   :  { %v509_v54 = vadd.f32 %v2776_v52, %v2482_v28 }
 0x2c2   :  { %1219 = vmatpush.bf16.msra.mxu0 %v2309_v13  ;;  %1233 = vmatpush.bf16.msra.mxu1 %v2311_v14 }
 0x2c3   :  { %1247 = vmatpush.bf16.msra.mxu2 %v2314_v19  ;;  %1261 = vmatpush.bf16.msra.mxu3 %v2307_v5  ;;  %v550_v5 = vadd.f32 %v2777_v63, %v2478_v2 }
 0x321   :  { %v1027_v49 = vpop.f32.mrf.mxu0  ;;  %v1041_v53 = vpop.f32.mrf.mxu1 }
 0x322   :  { %v1074_v59 = vadd.f32 %v1027_v49, %v431_v42  ;;  %v1075_v60 = vadd.f32 %v1041_v53, %v470_v48 }
 0x324   :  { %1891 = vtanh.f32 %v1074_v59 }
 0x325   :  { %1893 = vtanh.f32 %v1075_v60  ;;  %v2780_v60 = vld [vmem:[#allocation39_spill] sm:$0xff] }
 0x326   :  { %v475_v61 = vadd.f32 %v2780_v60, %v2470_v20 }
 0x328   :  { %v1055_v15 = vpop.f32.mrf.mxu2  ;;  %v1069_v16 = vpop.f32.mrf.mxu3 }
 0x329   :  { %v1077_v21 = vadd.f32 %v1069_v16, %v548_v1  ;;  %v1029_v25 = vpop.f32.mrf.mxu0  ;;  %v1043_v26 = vpop.f32.mrf.mxu1  ;;  %v1076_v14 = vadd.f32 %v1055_v15, %v509_v54  ;;  %v2782_v16 = vld [vmem:[#allocation42_spill] sm:$0xff] }
 0x32a   :  { %v1892_v30 = vpop.eup %1891  ;;  %v1078_v34 = vadd.f32 %v1029_v25, %v433_v8  ;;  %v1079_v35 = vadd.f32 %v1043_v26, %v472_v12  ;;  %v2781_v12 = vld [vmem:[#allocation41_spill] sm:$0xff]  ;;  %v2783_v25 = vld [vmem:[#allocation43_spill] sm:$0xff] }
 0x32b   :  { %v1894_v39 = vpop.eup %1893  ;;  %1895 = vtanh.f32 %v1077_v21  ;;  %v1090_v58 = vmul.f32 0.5, %v1892_v30  ;;  %v553_v15 = vadd.f32 %v2781_v12, %v2478_v2  ;;  %v438_v21 = vadd.f32 %v2782_v16, %v2468_v18  ;;  %v1801_v12 = vld [vmem:[#allocation11 + $0x20] sm:$0xff] }
 0x32c   :  { %v1091_v45 = vmul.f32 0.5, %v1894_v39  ;;  %1897 = vtanh.f32 %v1078_v34  ;;  %v477_v26 = vadd.f32 %v2783_v25, %v2470_v20 }
 0x32d   :  { %1899 = vtanh.f32 %v1079_v35  ;;  %v1096_v31 = vadd.f32 0.5, %v1090_v58 }
 0x32e   :  { %v1097_v13 = vadd.f32 0.5, %v1091_v45  ;;  %1901 = vtanh.f32 %v1076_v14 }
 0x330   :  { %v1057_v19 = vpop.f32.mrf.mxu2  ;;  %v1071_v50 = vpop.f32.mrf.mxu3  ;;  %v1102_v56 = vmul.f32 %v1097_v13, %v2602_v0  ;;  %v2784_v13 = vld [vmem:[#allocation40_spill] sm:$0xff] }
 0x331   :  { %v1081_v51 = vadd.f32 %v1071_v50, %v550_v5  ;;  %v1896_v24 = vpop.eup %1895  ;;  %v1080_v3 = vadd.f32 %v1057_v19, %v511_v46  ;;  %v514_v14 = vadd.f32 %v2784_v13, %v2482_v28  ;;  %v2785_v50 = vld [vmem:[#allocation45_spill] sm:$0xff] }
 0x332   :  { %v1898_v62 = vpop.eup %1897  ;;  %v1104_v40 = vmul.f32 %v1896_v24, %v1096_v31  ;;  %v555_v23 = vadd.f32 %v2785_v50, %v2478_v2  ;;  %v1798_v50 = vld [vmem:[#allocation11 + $0x8] sm:$0xff] }
 0x333   :  { %v1900_v27 = vpop.eup %1899  ;;  %1903 = vtanh.f32 %v1081_v51  ;;  %v1093_v37 = vmul.f32 0.5, %v1898_v62  ;;  %v2786_v62 = vld [vmem:[#allocation44_spill] sm:$0xff] }
 0x334   :  { %v2658_v32 = vadd.f32 %v1104_v40, %v1102_v56  ;;  %v1094_v4 = vmul.f32 0.5, %v1900_v27  ;;  %1905 = vtanh.f32 %v1080_v3  ;;  %v1902_v10 = vpop.eup %1901  ;;  %v516_v56 = vadd.f32 %v2786_v62, %v2482_v28 }
 0x335   :  { %v1099_v17 = vadd.f32 0.5, %v1093_v37  ;;  %v1092_v57 = vmul.f32 0.5, %v1902_v10 }
 0x336   :  { %v1100_v43 = vadd.f32 0.5, %v1094_v4  ;;  %1907 = vtanh.f32 %v2658_v32 }
 0x337   :  { %v1098_v55 = vadd.f32 0.5, %v1092_v57 }
 0x338   :  { %v1103_v6 = vmul.f32 %v1100_v43, %v2606_v36  ;;  %v2779_v36 = vld [vmem:[#allocation38_spill] sm:$0xff] }
 0x339   :  { %v1904_v41 = vpop.eup %1903  ;;  %v436_v59 = vadd.f32 %v2779_v36, %v2468_v18 }
 0x33a   :  { %v1105_v44 = vmul.f32 %v1904_v41, %v1099_v17  ;;  %v1906_v0 = vpop.eup %1905 }
 0x33b   :  { %v1095_v22 = vmul.f32 0.5, %v1906_v0 }
 0x33c   :  { %v2662_v33 = vadd.f32 %v1105_v44, %v1103_v6  ;;  %v1908_v11 = vpop.eup %1907 }
 0x33d   :  { %v1110_v29 = vmul.f32 %v1908_v11, %v1098_v55  ;;  %v1101_v38 = vadd.f32 0.5, %v1095_v22 }
 0x33e   :  { %1909 = vtanh.f32 %v2662_v33 }
 0x33f   :  { %1911 = vtanh.f32 %v1110_v29 }
 0x344   :  { %v1910_v42 = vpop.eup %1909 }
 0x345   :  { %v1111_v47 = vmul.f32 %v1910_v42, %v1101_v38  ;;  %v1912_v48 = vpop.eup %1911 }
 0x347   :  { %1913 = vtanh.f32 %v1111_v47 }
 0x34d   :  { %v1914_v49 = vpop.eup %1913 }
 0x34e   :  { %v1114_v53 = vpack.c.bf16 %v1914_v49, %v1912_v48 }
 0x350   :  { %1123 = vmatmul.bf16.vlgmr.msrb.gmra.mxu0 %v1114_v53  ;;  %1137 = vmatmul.bf16.vlgmr.msrb.gmra.mxu1 %v1114_v53 }
 0x351   :  { %1151 = vmatmul.bf16.vlgmr.msrb.gmra.mxu2 %v1114_v53  ;;  %1165 = vmatmul.bf16.vlgmr.msrb.gmra.mxu3 %v1114_v53 }
 0x3cd   :  { %v1124_v1 = vpop.f32.mrf.mxu0  ;;  %v1138_v7 = vpop.f32.mrf.mxu1 }
 0x3ce   :  { %v1171_v8 = vadd.f32 %v1124_v1, %v436_v59  ;;  %v1172_v9 = vadd.f32 %v1138_v7, %v475_v61 }
 0x3d0   :  { %1915 = vtanh.f32 %v1171_v8  ;;  %v1803_v8 = vld [vmem:[#allocation11 + $0x30] sm:$0xff] }
 0x3d1   :  { %1917 = vtanh.f32 %v1172_v9  ;;  %v1802_v9 = vld [vmem:[#allocation11 + $0x28] sm:$0xff] }
 0x3d4   :  { %v1152_v30 = vpop.f32.mrf.mxu2  ;;  %v1166_v34 = vpop.f32.mrf.mxu3 }
 0x3d5   :  { %v1174_v35 = vadd.f32 %v1166_v34, %v553_v15  ;;  %v1126_v39 = vpop.f32.mrf.mxu0  ;;  %v1140_v45 = vpop.f32.mrf.mxu1  ;;  %v1173_v31 = vadd.f32 %v1152_v30, %v514_v14  ;;  %v2787_v15 = vld [vmem:[#allocation46_spill] sm:$0xff] }
 0x3d6   :  { %v1916_v52 = vpop.eup %1915  ;;  %v1175_v54 = vadd.f32 %v1126_v39, %v438_v21  ;;  %v1176_v58 = vadd.f32 %v1140_v45, %v477_v26  ;;  %v441_v16 = vadd.f32 %v2787_v15, %v2468_v18  ;;  %v2788_v21 = vld [vmem:[#allocation47_spill] sm:$0xff]  ;;  %v1800_v26 = vld [vmem:[#allocation11 + $0x18] sm:$0xff] }
 0x3d7   :  { %v1918_v63 = vpop.eup %1917  ;;  %1919 = vtanh.f32 %v1174_v35  ;;  %v1187_v19 = vmul.f32 0.5, %v1916_v52  ;;  %v480_v25 = vadd.f32 %v2788_v21, %v2470_v20  ;;  %v1799_v45 = vld [vmem:[#allocation11 + $0x10] sm:$0xff]  ;;  %v2789_v52 = vld [vmem:[#allocation49_spill] sm:$0xff] }
 0x3d8   :  { %v1188_v5 = vmul.f32 0.5, %v1918_v63  ;;  %1921 = vtanh.f32 %v1175_v54  ;;  %v558_v54 = vadd.f32 %v2789_v52, %v2478_v2 }
 0x3d9   :  { %1923 = vtanh.f32 %v1176_v58  ;;  %v1193_v40 = vadd.f32 0.5, %v1187_v19  ;;  %v2790_v58 = vld [vmem:[#allocation50_spill] sm:$0xff] }
 0x3da   :  { %v1194_v46 = vadd.f32 0.5, %v1188_v5  ;;  %1925 = vtanh.f32 %v1173_v31  ;;  %v443_v63 = vadd.f32 %v2790_v58, %v2468_v18  ;;  %v2791_v5 = vld [vmem:[#allocation51_spill] sm:$0xff] }
 0x3db   :  { %v482_v13 = vadd.f32 %v2791_v5, %v2470_v20  ;;  %v2793_v20 = vld [vmem:[#allocation53_spill] sm:$0xff] }
 0x3dc   :  { %v1154_v51 = vpop.f32.mrf.mxu2  ;;  %v1168_v24 = vpop.f32.mrf.mxu3  ;;  %v1199_v4 = vmul.f32 %v1194_v46, %v2658_v32 }
 0x3dd   :  { %v1178_v3 = vadd.f32 %v1168_v24, %v555_v23  ;;  %v1920_v27 = vpop.eup %1919  ;;  %v1177_v10 = vadd.f32 %v1154_v51, %v516_v56  ;;  %v2792_v23 = vld [vmem:[#allocation48_spill] sm:$0xff] }
 0x3de   :  { %v1922_v37 = vpop.eup %1921  ;;  %v1201_v43 = vmul.f32 %v1920_v27, %v1193_v40  ;;  %v519_v46 = vadd.f32 %v2792_v23, %v2482_v28 }
 0x3df   :  { %v1924_v17 = vpop.eup %1923  ;;  %1927 = vtanh.f32 %v1178_v3  ;;  %v1190_v6 = vmul.f32 0.5, %v1922_v37  ;;  %v1797_v3 = vld [vmem:[#allocation11] sm:$0xff] }
 0x3e0   :  { %v2682_v41 = vadd.f32 %v1201_v43, %v1199_v4  ;;  %v1191_v44 = vmul.f32 0.5, %v1924_v17  ;;  %1929 = vtanh.f32 %v1177_v10  ;;  %v1926_v57 = vpop.eup %1925  ;;  %v560_v43 = vadd.f32 %v2793_v20, %v2478_v2  ;;  %v2794_v17 = vld [vmem:[#allocation52_spill] sm:$0xff] }
 0x3e1   :  { %v1196_v11 = vadd.f32 0.5, %v1190_v6  ;;  %v1189_v38 = vmul.f32 0.5, %v1926_v57  ;;  %v521_v6 = vadd.f32 %v2794_v17, %v2482_v28 }
 0x3e2   :  { %v1197_v0 = vadd.f32 0.5, %v1191_v44  ;;  %1931 = vtanh.f32 %v2682_v41 }
 0x3e3   :  { %v1195_v49 = vadd.f32 0.5, %v1189_v38 }
 0x3e4   :  { %v1200_v55 = vmul.f32 %v1197_v0, %v2662_v33  ;;  %v1804_v33 = vld [vmem:[#allocation11 + $0x38] sm:$0xff] }
 0x3e5   :  { %v1928_v22 = vpop.eup %1927  ;;  %1377 = vmatpush.bf16.msrb.mxu0 %v1804_v33 }
 0x3e6   :  { %v1202_v29 = vmul.f32 %v1928_v22, %v1196_v11  ;;  %v1930_v32 = vpop.eup %1929 }
 0x3e7   :  { %v1192_v48 = vmul.f32 0.5, %v1930_v32 }
 0x3e8   :  { %v2686_v42 = vadd.f32 %v1202_v29, %v1200_v55  ;;  %v1932_v47 = vpop.eup %1931 }
 0x3e9   :  { %v1207_v53 = vmul.f32 %v1932_v47, %v1195_v49  ;;  %v1198_v36 = vadd.f32 0.5, %v1192_v48  ;;  %1378 = vmatpush.bf16.msrb.mxu0 %v1803_v8 }
 0x3ea   :  { %1933 = vtanh.f32 %v2686_v42 }
 0x3eb   :  { %1935 = vtanh.f32 %v1207_v53 }
 0x3ed   :  { %1379 = vmatpush.bf16.msrb.mxu0 %v1802_v9 }
 0x3f0   :  { %v1934_v59 = vpop.eup %1933 }
 0x3f1   :  { %v1208_v60 = vmul.f32 %v1934_v59, %v1198_v36  ;;  %v1936_v61 = vpop.eup %1935  ;;  %1380 = vmatpush.bf16.msrb.mxu0 %v1801_v12 }
 0x3f3   :  { %1937 = vtanh.f32 %v1208_v60 }
 0x3f5   :  { %1381 = vmatpush.bf16.msrb.mxu0 %v1800_v26 }
 0x3f9   :  { %v1938_v1 = vpop.eup %1937  ;;  %1382 = vmatpush.bf16.msrb.mxu0 %v1799_v45 }
 0x3fa   :  { %v1211_v7 = vpack.c.bf16 %v1938_v1, %v1936_v61 }
 0x3fc   :  { %1220 = vmatmul.bf16.vlgmr.msra.gmra.mxu0 %v1211_v7  ;;  %1234 = vmatmul.bf16.vlgmr.msra.gmra.mxu1 %v1211_v7 }
 0x3fd   :  { %1248 = vmatmul.bf16.vlgmr.msra.gmra.mxu2 %v1211_v7  ;;  %1262 = vmatmul.bf16.vlgmr.msra.gmra.mxu3 %v1211_v7 }
 0x3fe   :  { %1383 = vmatpush.bf16.msrb.mxu0 %v1798_v50 }
 0x402   :  { %1384 = vmatpush.bf16.msrb.mxu0 %v1797_v3 }
 0x479   :  { %v1221_v30 = vpop.f32.mrf.mxu0  ;;  %v1235_v34 = vpop.f32.mrf.mxu1 }
 0x47a   :  { %v1268_v35 = vadd.f32 %v1221_v30, %v441_v16  ;;  %v1269_v39 = vadd.f32 %v1235_v34, %v480_v25 }
 0x47c   :  { %1939 = vtanh.f32 %v1268_v35 }
 0x47d   :  { %1941 = vtanh.f32 %v1269_v39 }
 0x480   :  { %v1249_v14 = vpop.f32.mrf.mxu2  ;;  %v1263_v19 = vpop.f32.mrf.mxu3 }
 0x481   :  { %v1271_v31 = vadd.f32 %v1263_v19, %v558_v54  ;;  %v1223_v51 = vpop.f32.mrf.mxu0  ;;  %v1237_v24 = vpop.f32.mrf.mxu1  ;;  %v1270_v37 = vadd.f32 %v1249_v14, %v519_v46 }
 0x482   :  { %v1940_v62 = vpop.eup %1939  ;;  %v1272_v56 = vadd.f32 %v1223_v51, %v443_v63  ;;  %v1273_v40 = vadd.f32 %v1237_v24, %v482_v13 }
 0x483   :  { %v1942_v27 = vpop.eup %1941  ;;  %1943 = vtanh.f32 %v1271_v31  ;;  %v1284_v4 = vmul.f32 0.5, %v1940_v62 }
 0x484   :  { %v1285_v18 = vmul.f32 0.5, %v1942_v27  ;;  %1945 = vtanh.f32 %v1272_v56 }
 0x485   :  { %1947 = vtanh.f32 %v1273_v40  ;;  %v1290_v57 = vadd.f32 0.5, %v1284_v4 }
 0x486   :  { %v1291_v10 = vadd.f32 0.5, %v1285_v18  ;;  %1949 = vtanh.f32 %v1270_v37 }
 0x488   :  { %v1251_v44 = vpop.f32.mrf.mxu2  ;;  %v1265_v0 = vpop.f32.mrf.mxu3  ;;  %v1296_v32 = vmul.f32 %v1291_v10, %v2682_v41 }
 0x489   :  { %v1275_v11 = vadd.f32 %v1265_v0, %v560_v43  ;;  %v1944_v22 = vpop.eup %1943  ;;  %v1274_v55 = vadd.f32 %v1251_v44, %v521_v6 }
 0x48a   :  { %v1946_v29 = vpop.eup %1945  ;;  %v1298_v38 = vmul.f32 %v1944_v22, %v1290_v57 }
 0x48b   :  { %v1948_v47 = vpop.eup %1947  ;;  %1951 = vtanh.f32 %v1275_v11  ;;  %v1287_v2 = vmul.f32 0.5, %v1946_v29 }
 0x48c   :  { %v1950_v48 = vpop.eup %1949  ;;  %v1300_v49 = vadd.f32 %v1298_v38, %v1296_v32  ;;  %v1288_v53 = vmul.f32 0.5, %v1948_v47  ;;  %1953 = vtanh.f32 %v1274_v55 }
 0x48d   :  { %v1286_v28 = vmul.f32 0.5, %v1950_v48  ;;  %v1293_v59 = vadd.f32 0.5, %v1287_v2 }
 0x48e   :  { %1955 = vtanh.f32 %v1300_v49  ;;  %v1294_v36 = vadd.f32 0.5, %v1288_v53 }
 0x48f   :  { %v1292_v33 = vadd.f32 0.5, %v1286_v28 }
 0x490   :  { %v1297_v61 = vmul.f32 %v1294_v36, %v2686_v42  ;;  %v1818_v42 = vld [vmem:[%s2723_s7] ss:$0 sm:$0xff] }
 0x491   :  { %v1952_v60 = vpop.eup %1951 }
 0x492   :  { %v1299_v1 = vmul.f32 %v1952_v60, %v1293_v59  ;;  %v1954_v7 = vpop.eup %1953 }
 0x493   :  { %v1289_v12 = vmul.f32 0.5, %v1954_v7 }
 0x494   :  { %v1956_v8 = vpop.eup %1955  ;;  %v1301_v41 = vadd.f32 %v1299_v1, %v1297_v61 }
 0x495   :  { %v1304_v9 = vmul.f32 %v1956_v8, %v1292_v33  ;;  %v1295_v15 = vadd.f32 0.5, %v1289_v12 }
 0x496   :  { %1957 = vtanh.f32 %v1301_v41 }
 0x497   :  { %1959 = vtanh.f32 %v1304_v9 }
 0x49c   :  { %v1958_v16 = vpop.eup %1957 }
 0x49d   :  { %v1305_v21 = vmul.f32 %v1958_v16, %v1295_v15  ;;  %v1960_v25 = vpop.eup %1959 }
 0x49f   :  { %1961 = vtanh.f32 %v1305_v21 }
 0x4a5   :  { %v1962_v26 = vpop.eup %1961 }
 0x4a6   :  { %v1308_v30 = vpack.c.bf16 %v1962_v26, %v1960_v25 }
 0x4a8   :  { %1385 = vmatmul.bf16.vlgmr.msrb.gmra.mxu0 %v1308_v30 }
 0x525   :  { %v1386_v34 = vpop.f32.mrf.mxu0 }
 0x526   :  { %v1387_v35 = vadd.f32 %v1818_v42, %v1386_v34 }
 0x528   :  { %1391 = vst [vmem:[#allocation13] sm:$0xff] %v1387_v35 }
 0x52d   :  { %v1388_v39 = vpop.f32.mrf.mxu0 }
 0x52e   :  { %v1389_v45 = vadd.f32 %v1818_v42, %v1388_v39 }
 0x530   :  { %1392 = vst [vmem:[#allocation13 + $0x8] sm:$0xff] %v1389_v45 }
 0x531   :  { %1405 = dma.vmem_to_hbm [thread:$0]  %s1398_s18, 256, %s1400_s21, [#allocation4], %s2142_s13, %s2142_s13, %s2143_s14  }
 0x532   :  { %2139 = dma.done.wait [#allocation4], 256  }
 0x533   :  { %2140 = vsyncadd [#allocation4], 4294967040 }
 0x534   :  { %1410 = vsyncpa [#allocation3], 1 }
 0x535   :  { %1411 = vsyncpa [#allocation6], 1 }
 0x536   :  { %1412 = vsyncpa [#allocation9], 1 }
 0x537   :  { %1413 = vsyncpa [#allocation12], 1 }
 0x538   :  { %1414 = vsyncpa [#allocation4], 1 }

</bundles_post_ra>
